<compile_context>
chip_gen: v6e
topology: v6e:2x2x1
jax: 0.10.0
libtpu: 0.0.40
codegen_flags: <defaults>
</compile_context>

<pallas_src>
import functools

import jax
import jax.numpy as jnp
from jax.experimental import pallas as pl
from jax.experimental.pallas import tpu as pltpu


def _leaky_relu(x, slope=0.2):
    # For slope in (0,1): max(x, slope*x) == leaky_relu(x); one fewer VALU op
    # than where(x>0, x, slope*x).
    return jnp.maximum(x, slope * x)


def _round_up(n, m):
    return (n + m - 1) // m * m


def mlp_kernel(x_ref, w1_ref, b1_ref, w2_ref, b2_ref, w3_ref, b3_ref, o_ref):
    # fc1: cast x to bf16 in-VMEM (no wrapper convert op), f32 accumulation.
    x = x_ref[...].astype(w1_ref.dtype)
    h1 = jnp.dot(x, w1_ref[...], preferred_element_type=jnp.float32)
    h1 = _leaky_relu(h1 + b1_ref[...])
    # dropout(p=0.1) -> identity in eval mode.
    # fc2
    h2 = jnp.dot(h1.astype(w2_ref.dtype), w2_ref[...],
                 preferred_element_type=jnp.float32)
    h2 = _leaky_relu(h2 + b2_ref[...])
    # dropout(p=0.1) -> identity in eval mode.
    # fc3 (no activation); output columns beyond nclass are zero-padded lanes.
    o = jnp.dot(h2.astype(w3_ref.dtype), w3_ref[...],
                preferred_element_type=jnp.float32)
    o_ref[...] = (o + b3_ref[...]).astype(o_ref.dtype)


def prepare_params(params):
    """One-time pad + cast of weights/biases into kernel layout.

    Call once and reuse the result; keeps the per-call hot path down to a single
    pallas_call (+ output slice).
    """
    w1, b1, w2, b2, w3, b3 = params
    C = w3.shape[1]
    C_pad = _round_up(C, 128)  # lane-dense output stores
    bf16 = jnp.bfloat16
    w1_p = w1.astype(bf16)
    w2_p = w2.astype(bf16)
    w3_p = jnp.zeros((w3.shape[0], C_pad), bf16).at[:, :C].set(w3.astype(bf16))
    b1_p = b1.astype(jnp.float32).reshape(1, -1)
    b2_p = b2.astype(jnp.float32).reshape(1, -1)
    b3_p = jnp.zeros((1, C_pad), jnp.float32).at[:, :C].set(
        b3.astype(jnp.float32).reshape(1, -1))
    return (w1_p, b1_p, w2_p, b2_p, w3_p, b3_p)


def default_grid_steps():
    """>= 2 grid steps on v7x (2 TensorCores/chip), 1 otherwise (grid is serial)."""
    try:
        kind = jax.devices()[0].device_kind.lower()
    except Exception:
        return 1
    return 2 if "v7" in kind else 1


@functools.partial(jax.jit,
                   static_argnames=("nclass", "min_grid_steps", "max_batch_tile"))
def class_s_forward(x, prepared_params, *, nclass, min_grid_steps=1,
                    max_batch_tile=1024):
    """Fused forward pass of CLASS_S.

    x: (B, input_dim) float32; prepared_params: output of prepare_params().
    """
    w1, b1, w2, b2, w3, b3 = prepared_params
    B, D = x.shape
    H1 = w1.shape[1]
    H2 = w2.shape[1]
    C_pad = w3.shape[1]

    # Batch tiling: single step on single-TC chips; >= min_grid_steps on v7x so
    # both cores get a "parallel" step; cap tile size to bound VMEM for large B.
    B8 = _round_up(B, 8)
    steps = max(min_grid_steps, pl.cdiv(B8, max_batch_tile))
    tb = _round_up(pl.cdiv(B8, steps), 8)
    B_pad = _round_up(B, tb)

    x_in = x if B_pad == B else jnp.zeros((B_pad, D), x.dtype).at[:B].set(x)

    grid = (B_pad // tb,)

    # Weights/biases: full-array blocks with constant index_maps -> resident
    # across the batch grid (fetched once, ~0.5 MB total in bf16).
    def full(shape):
        return pl.BlockSpec(shape, lambda i: (0, 0))

    out = pl.pallas_call(
        mlp_kernel,
        out_shape=jax.ShapeDtypeStruct((B_pad, C_pad), jnp.float32),
        grid_spec=pl.GridSpec(
            grid=grid,
            in_specs=[
                pl.BlockSpec((tb, D), lambda i: (i, 0)),   # x batch tile (native D)
                full((D, H1)),                              # w1
                full((1, H1)),                              # b1
                full((H1, H2)),                             # w2
                full((1, H2)),                              # b2
                full((H2, C_pad)),                          # w3
                full((1, C_pad)),                           # b3
            ],
            out_specs=pl.BlockSpec((tb, C_pad), lambda i: (i, 0)),
        ),
        compiler_params=pltpu.CompilerParams(
            dimension_semantics=("parallel",)),
    )(x_in, w1, b1, w2, b2, w3, b3)

    # If the consumer tolerates the padded (B_pad, 128) slab, return `out`
    # directly and drop this slice (one fewer op on an overhead-bound path).
    return out[:B, :nclass]


def init_params(key, input_dim, hidden_dim1, hidden_dim2, nclass):
    """Deterministic synthetic init (mimics weights_init with N(0, 0.02))."""
    ks = jax.random.split(key, 6)
    w1 = jax.random.normal(ks[0], (input_dim, hidden_dim1), jnp.float32) * 0.02
    b1 = jnp.zeros((1, hidden_dim1), jnp.float32)
    w2 = jax.random.normal(ks[1], (hidden_dim1, hidden_dim2), jnp.float32) * 0.02
    b2 = jnp.zeros((1, hidden_dim2), jnp.float32)
    w3 = jax.random.normal(ks[2], (hidden_dim2, nclass), jnp.float32) * 0.02
    b3 = jnp.zeros((1, nclass), jnp.float32)
    return (w1, b1, w2, b2, w3, b3)


def reference_forward(x, params):
    """Pure-JAX f32 reference for correctness checking."""
    w1, b1, w2, b2, w3, b3 = params
    h1 = jnp.where(x @ w1 + b1 > 0, x @ w1 + b1, 0.2 * (x @ w1 + b1))
    h2 = jnp.where(h1 @ w2 + b2 > 0, h1 @ w2 + b2, 0.2 * (h1 @ w2 + b2))
    return h2 @ w3 + b3


if __name__ == "__main__":
    # Shapes consistent with the module: input_dim=64, hidden 512/256, nclass=10.
    # batch=256 is small, exercises a 2-step parallel grid on v7x (tb=128) and a
    # single-step grid on v5e/v6e (tb=256).
    batch, input_dim = 256, 64
    hidden_dim1, hidden_dim2 = 512, 256
    nclass = 10

    key = jax.random.PRNGKey(0)
    kx, kp = jax.random.split(key)
    x = jax.random.normal(kx, (batch, input_dim), jnp.float32)
    params = init_params(kp, input_dim, hidden_dim1, hidden_dim2, nclass)

    # One-time param prep (hoisted out of the per-call hot path).
    prepared = prepare_params(params)
    steps = default_grid_steps()

    out = class_s_forward(x, prepared, nclass=nclass, min_grid_steps=steps)
    out = jax.block_until_ready(out)

    ref = reference_forward(x, params)
    assert out.shape == (batch, nclass), out.shape
    # bf16 MXU operands with f32 accumulation -> loosened tolerance vs f32 ref.
    assert jnp.allclose(out, ref, atol=5e-3, rtol=5e-2), "mismatch vs reference"

    print("KERNEL_OK")
</pallas_src>

<mosaic_0001>
module attributes {stable_mosaic.version = 11 : i64} {
  func.func @mlp_kernel(%arg0: i32, %arg1: memref<256x64xf32, #tpu.memory_space<vmem>>, %arg2: memref<64x512xbf16, #tpu.memory_space<vmem>>, %arg3: memref<1x512xf32, #tpu.memory_space<vmem>>, %arg4: memref<512x256xbf16, #tpu.memory_space<vmem>>, %arg5: memref<1x256xf32, #tpu.memory_space<vmem>>, %arg6: memref<256x128xbf16, #tpu.memory_space<vmem>>, %arg7: memref<1x128xf32, #tpu.memory_space<vmem>>, %arg8: memref<256x128xf32, #tpu.memory_space<vmem>>) attributes {dimension_semantics = [#tpu.dimension_semantics<parallel>], iteration_bounds = array<i64: 1>, scalar_prefetch = 0 : i64, scratch_operands = 0 : i64, tpu.core_type = #tpu.core_type<tc>, window_params = [{transform_indices = @transform_0, window_bounds = array<i64: 256, 64>}, {pipeline_mode = #tpu.pipeline_mode<synchronous>, transform_indices = @transform_1, window_bounds = array<i64: 64, 512>}, {pipeline_mode = #tpu.pipeline_mode<synchronous>, transform_indices = @transform_2, window_bounds = array<i64: 1, 512>}, {pipeline_mode = #tpu.pipeline_mode<synchronous>, transform_indices = @transform_3, window_bounds = array<i64: 512, 256>}, {pipeline_mode = #tpu.pipeline_mode<synchronous>, transform_indices = @transform_4, window_bounds = array<i64: 1, 256>}, {pipeline_mode = #tpu.pipeline_mode<synchronous>, transform_indices = @transform_5, window_bounds = array<i64: 256, 128>}, {pipeline_mode = #tpu.pipeline_mode<synchronous>, transform_indices = @transform_6, window_bounds = array<i64: 1, 128>}, {transform_indices = @transform_7, window_bounds = array<i64: 256, 128>}]} {
    %c0 = arith.constant 0 : index
    %c0_0 = arith.constant 0 : index
    %0 = vector.load %arg1[%c0, %c0_0] : memref<256x64xf32, #tpu.memory_space<vmem>>, vector<256x64xf32>
    %1 = arith.truncf %0 : vector<256x64xf32> to vector<256x64xbf16>
    %c0_1 = arith.constant 0 : index
    %c0_2 = arith.constant 0 : index
    %2 = vector.load %arg2[%c0_1, %c0_2] : memref<64x512xbf16, #tpu.memory_space<vmem>>, vector<64x512xbf16>
    %cst = arith.constant dense<0.000000e+00> : vector<256x512xf32>
    %3 = tpu.matmul %1, %2, %cst {dimension_numbers = #tpu.dot_dimension_numbers<[1], [0], [0], [1], [0, 0, 1, 1], [], []>} : vector<256x64xbf16>, vector<64x512xbf16>, vector<256x512xf32> -> vector<256x512xf32>
    %c0_3 = arith.constant 0 : index
    %c0_4 = arith.constant 0 : index
    %4 = vector.load %arg3[%c0_3, %c0_4] : memref<1x512xf32, #tpu.memory_space<vmem>>, vector<1x512xf32>
    %5 = vector.broadcast %4 : vector<1x512xf32> to vector<256x512xf32>
    %6 = arith.addf %3, %5 : vector<256x512xf32>
    %cst_5 = arith.constant 2.000000e-01 : f32
    %7 = vector.broadcast %cst_5 : f32 to vector<256x512xf32>
    %8 = arith.mulf %7, %6 : vector<256x512xf32>
    %9 = arith.maximumf %6, %8 : vector<256x512xf32>
    %10 = arith.truncf %9 : vector<256x512xf32> to vector<256x512xbf16>
    %c0_6 = arith.constant 0 : index
    %c0_7 = arith.constant 0 : index
    %11 = vector.load %arg4[%c0_6, %c0_7] : memref<512x256xbf16, #tpu.memory_space<vmem>>, vector<512x256xbf16>
    %cst_8 = arith.constant dense<0.000000e+00> : vector<256x256xf32>
    %12 = tpu.matmul %10, %11, %cst_8 {dimension_numbers = #tpu.dot_dimension_numbers<[1], [0], [0], [1], [0, 0, 1, 1], [], []>} : vector<256x512xbf16>, vector<512x256xbf16>, vector<256x256xf32> -> vector<256x256xf32>
    %c0_9 = arith.constant 0 : index
    %c0_10 = arith.constant 0 : index
    %13 = vector.load %arg5[%c0_9, %c0_10] : memref<1x256xf32, #tpu.memory_space<vmem>>, vector<1x256xf32>
    %14 = vector.broadcast %13 : vector<1x256xf32> to vector<256x256xf32>
    %15 = arith.addf %12, %14 : vector<256x256xf32>
    %cst_11 = arith.constant 2.000000e-01 : f32
    %16 = vector.broadcast %cst_11 : f32 to vector<256x256xf32>
    %17 = arith.mulf %16, %15 : vector<256x256xf32>
    %18 = arith.maximumf %15, %17 : vector<256x256xf32>
    %19 = arith.truncf %18 : vector<256x256xf32> to vector<256x256xbf16>
    %c0_12 = arith.constant 0 : index
    %c0_13 = arith.constant 0 : index
    %20 = vector.load %arg6[%c0_12, %c0_13] : memref<256x128xbf16, #tpu.memory_space<vmem>>, vector<256x128xbf16>
    %cst_14 = arith.constant dense<0.000000e+00> : vector<256x128xf32>
    %21 = tpu.matmul %19, %20, %cst_14 {dimension_numbers = #tpu.dot_dimension_numbers<[1], [0], [0], [1], [0, 0, 1, 1], [], []>} : vector<256x256xbf16>, vector<256x128xbf16>, vector<256x128xf32> -> vector<256x128xf32>
    %c0_15 = arith.constant 0 : index
    %c0_16 = arith.constant 0 : index
    %22 = vector.load %arg7[%c0_15, %c0_16] : memref<1x128xf32, #tpu.memory_space<vmem>>, vector<1x128xf32>
    %23 = vector.broadcast %22 : vector<1x128xf32> to vector<256x128xf32>
    %24 = arith.addf %21, %23 : vector<256x128xf32>
    %c0_17 = arith.constant 0 : index
    %c0_18 = arith.constant 0 : index
    %25 = vector.load %arg8[%c0_17, %c0_18] : memref<256x128xf32, #tpu.memory_space<vmem>>, vector<256x128xf32>
    tpu.vector_store %arg8[%c0_17, %c0_18], %24 {strides = array<i32>} : memref<256x128xf32, #tpu.memory_space<vmem>>, vector<256x128xf32>,
    return
  }
  func.func @transform_0(%arg0: i32) -> (i32, i32) {
    %c0_i32 = arith.constant 0 : i32
    %c0_i32_0 = arith.constant 0 : i32
    return %arg0, %c0_i32 : i32, i32
  }
  func.func @transform_1(%arg0: i32) -> (i32, i32) {
    %c0_i32 = arith.constant 0 : i32
    %c0_i32_0 = arith.constant 0 : i32
    %c0_i32_1 = arith.constant 0 : i32
    return %c0_i32, %c0_i32_0 : i32, i32
  }
  func.func @transform_2(%arg0: i32) -> (i32, i32) {
    %c0_i32 = arith.constant 0 : i32
    %c0_i32_0 = arith.constant 0 : i32
    %c0_i32_1 = arith.constant 0 : i32
    return %c0_i32, %c0_i32_0 : i32, i32
  }
  func.func @transform_3(%arg0: i32) -> (i32, i32) {
    %c0_i32 = arith.constant 0 : i32
    %c0_i32_0 = arith.constant 0 : i32
    %c0_i32_1 = arith.constant 0 : i32
    return %c0_i32, %c0_i32_0 : i32, i32
  }
  func.func @transform_4(%arg0: i32) -> (i32, i32) {
    %c0_i32 = arith.constant 0 : i32
    %c0_i32_0 = arith.constant 0 : i32
    %c0_i32_1 = arith.constant 0 : i32
    return %c0_i32, %c0_i32_0 : i32, i32
  }
  func.func @transform_5(%arg0: i32) -> (i32, i32) {
    %c0_i32 = arith.constant 0 : i32
    %c0_i32_0 = arith.constant 0 : i32
    %c0_i32_1 = arith.constant 0 : i32
    return %c0_i32, %c0_i32_0 : i32, i32
  }
  func.func @transform_6(%arg0: i32) -> (i32, i32) {
    %c0_i32 = arith.constant 0 : i32
    %c0_i32_0 = arith.constant 0 : i32
    %c0_i32_1 = arith.constant 0 : i32
    return %c0_i32, %c0_i32_0 : i32, i32
  }
  func.func @transform_7(%arg0: i32) -> (i32, i32) {
    %c0_i32 = arith.constant 0 : i32
    %c0_i32_0 = arith.constant 0 : i32
    return %arg0, %c0_i32 : i32, i32
  }
}

</mosaic_0001>

<bundles_post_ra>
// kernel: class_s_forward.1
= control target key start
LH: loop header
LB: loop body
LE: loop exit
PB: predicated region body
PF: predicated region fallthrough
CT: control target
= control target key end

     0   :  { %12 = vsyncpa [#allocation3], 0  ;;  %s2648_s24 = smov [#allocation2]   ;;  %s3594_s0 = inlined_call_operand.vmem [shape: f32[256,64], index: 0, kind: input, shape index: {}]   ;;  %s3595_s1 = inlined_call_operand.vmem [shape: bf16[64,512], index: 1, kind: input, shape index: {}]   ;;  %s3596_s2 = inlined_call_operand.vmem [shape: f32[1,512], index: 2, kind: input, shape index: {}]   ;;  %s3597_s3 = inlined_call_operand.hbm [shape: bf16[512,256], index: 3, kind: input, shape index: {}]   ;;  %s3598_s4 = inlined_call_operand.vmem [shape: f32[1,256], index: 4, kind: input, shape index: {}]   ;;  %s3599_s5 = inlined_call_operand.vmem [shape: bf16[256,128], index: 5, kind: input, shape index: {}]   ;;  %s3600_s6 = inlined_call_operand.vmem [shape: f32[1,128], index: 6, kind: input, shape index: {}]   ;;  %s3601_s7 = inlined_call_operand.vmem [shape: f32[256,128], index: 7, kind: output, shape index: {}]  }
   0x1   :  { %s24_s25 = sshll.u32 %s2648_s24, 4  ;;  %s25_s25 = int_to_ptr.vmem [resolvable:$true] %s24_s25 }
   0x2   :  { %s2634_s26 = scalar_lea.vmem %s25_s25, 8192  ;;  %p2639_p1 = scmp.lt.s32.totalorder %s25_s25, %s25_s25 }
   0x3   :  { %p2635_p0 = scmp.ne.s32.totalorder %s25_s25, %s2634_s26  ;;  %p2640_p2 = scmp.lt.s32.totalorder %s2634_s26, %s2634_s26 }
   0x5   :  { %p2641_p3 = por %p2640_p2, %p2639_p1 }
   0x7   :  { %p2642_p4 = pnand %p2641_p3, %p2635_p0 }
   0x9   :  { %2645 = shalt.err (!%p2642_p4)
}
   0xa   :  { %s2649_s27 = smov 128   ;;  %s2650_s28 = smov 8  }
   0xb   :  { %30 = dma.hbm_to_vmem [thread:$0]  %s3597_s3, 8192, %s25_s25, [#allocation3], %s2649_s27, %s2649_s27, %s2650_s28  }
   0xc   :  { %2646 = dma.done.wait [#allocation3], 8192  }
   0xd   :  { %2647 = vsyncadd [#allocation3], 4294959104  ;;  %v2651_v0 = vmov 0   ;;  %v2490_v1 = vld [vmem:[%s3595_s1 + $0x64] ss:$16 sps:$4 sm:$0xff]   ;;  %v42_v10 = vld [vmem:[%s3594_s0 + $0x8] sm:$0xff] }
   0xe   :  { %288 = vmatprep.mubr.bf16.mxu0 %v2651_v0  ;;  %368 = vmatprep.mubr.bf16.mxu1 %v2651_v0  ;;  %v2492_v2 = vld [vmem:[%s3595_s1 + $0x60] ss:$16 sps:$4 sm:$0xff]   ;;  %v2493_v3 = vld [vmem:[%s3595_s1 + $0x44] ss:$16 sps:$4 sm:$0xff]   ;;  %v58_v12 = vld [vmem:[%s3594_s0 + $0x88] sm:$0xff]  ;;  %vm207_vm0 = vcmask 523264  }
   0xf   :  { %264 = vmatprep.subr.bf16.mxu0 %v2490_v1  ;;  %2478 = vmatprep.subr.bf16.mxu1 %v2490_v1  ;;  %v2495_v4 = vld [vmem:[%s3595_s1 + $0x40] ss:$16 sps:$4 sm:$0xff]   ;;  %v2496_v5 = vld [vmem:[%s3595_s1 + $0x24] ss:$16 sps:$4 sm:$0xff]   ;;  %v2504_v13 = vld [vmem:[%s3595_s1 + $0x6c] ss:$16 sps:$4 sm:$0xff]  }
  0x10   :  { %265 = vmatpush1.bf16.msra.mxu0 %v2492_v2  ;;  %2482 = vmatpush1.bf16.msra.mxu1 %v2492_v2  ;;  %v2498_v6 = vld [vmem:[%s3595_s1 + $0x20] ss:$16 sps:$4 sm:$0xff]   ;;  %v2499_v7 = vld [vmem:[%s3595_s1 + $0x4] ss:$16 sps:$4 sm:$0xff]   ;;  %v2502_v16 = vld [vmem:[%s3595_s1 + $0x68] ss:$16 sps:$4 sm:$0xff]  }
  0x11   :  { %266 = vmatprep.subr.bf16.mxu0 %v2493_v3  ;;  %2479 = vmatprep.subr.bf16.mxu1 %v2493_v3  ;;  %v2501_v8 = vld [vmem:[%s3595_s1] ss:$16 sps:$4 sm:$0xff]   ;;  %v2507_v17 = vld [vmem:[%s3595_s1 + $0x4c] ss:$16 sps:$4 sm:$0xff]   ;;  %v2505_v22 = vld [vmem:[%s3595_s1 + $0x48] ss:$16 sps:$4 sm:$0xff]  }
  0x12   :  { %v41_v9 = vld [vmem:[%s3594_s0] sm:$0xff]  ;;  %v43_v18 = vld [vmem:[%s3594_s0 + $0x10] sm:$0xff]  ;;  %v44_v19 = vld [vmem:[%s3594_s0 + $0x18] sm:$0xff] }
  0x13   :  { %v57_v11 = vld [vmem:[%s3594_s0 + $0x80] sm:$0xff]  ;;  %v2736_v14 = vpack.c.bf16 %v42_v10, %v41_v9  ;;  %v59_v20 = vld [vmem:[%s3594_s0 + $0x90] sm:$0xff]  ;;  %v60_v21 = vld [vmem:[%s3594_s0 + $0x98] sm:$0xff]  ;;  %v2770_v24 = vpack.c.bf16 %v44_v19, %v43_v18 }
  0x14   :  { %267 = vmatpush1.bf16.msra.mxu0 %v2495_v4  ;;  %2483 = vmatpush1.bf16.msra.mxu1 %v2495_v4  ;;  %v2738_v15 = vpack.c.bf16 %v58_v12, %v57_v11  ;;  %v2510_v23 = vld [vmem:[%s3595_s1 + $0x2c] ss:$16 sps:$4 sm:$0xff]   ;;  %v2772_v25 = vpack.c.bf16 %v60_v21, %v59_v20  ;;  %v2508_v26 = vld [vmem:[%s3595_s1 + $0x28] ss:$16 sps:$4 sm:$0xff]   ;;  %v45_v28 = vld [vmem:[%s3594_s0 + $0x20] sm:$0xff] }
  0x15   :  { %268 = vmatprep.subr.bf16.mxu0 %v2496_v5  ;;  %2480 = vmatprep.subr.bf16.mxu1 %v2496_v5  ;;  %v2513_v27 = vld [vmem:[%s3595_s1 + $0xc] ss:$16 sps:$4 sm:$0xff]   ;;  %v61_v30 = vld [vmem:[%s3594_s0 + $0xa0] sm:$0xff]  ;;  %v2511_v32 = vld [vmem:[%s3595_s1 + $0x8] ss:$16 sps:$4 sm:$0xff]  }
  0x16   :  { %v46_v29 = vld [vmem:[%s3594_s0 + $0x28] sm:$0xff]  ;;  %v2516_v35 = vld [vmem:[#allocation2 + $0x74] ss:$8 sps:$4 sm:$0xff]   ;;  %v2514_v38 = vld [vmem:[#allocation2 + $0x70] ss:$8 sps:$4 sm:$0xff]  }
  0x17   :  { %v62_v31 = vld [vmem:[%s3594_s0 + $0xa8] sm:$0xff]  ;;  %v2801_v33 = vpack.c.bf16 %v46_v29, %v45_v28  ;;  %v47_v36 = vld [vmem:[%s3594_s0 + $0x30] sm:$0xff]  ;;  %v48_v37 = vld [vmem:[%s3594_s0 + $0x38] sm:$0xff] }
  0x18   :  { %269 = vmatpush1.bf16.msra.mxu0 %v2498_v6  ;;  %2484 = vmatpush1.bf16.msra.mxu1 %v2498_v6  ;;  %v2803_v34 = vpack.c.bf16 %v62_v31, %v61_v30  ;;  %v63_v39 = vld [vmem:[%s3594_s0 + $0xb0] sm:$0xff]  ;;  %v64_v40 = vld [vmem:[%s3594_s0 + $0xb8] sm:$0xff]  ;;  %v2520_v42 = vld [vmem:[#allocation2 + $0x60] ss:$8 sps:$4 sm:$0xff]   ;;  %v2823_v44 = vpack.c.bf16 %v48_v37, %v47_v36 }
  0x19   :  { %270 = vmatprep.subr.bf16.mxu0 %v2499_v7  ;;  %2481 = vmatprep.subr.bf16.mxu1 %v2499_v7  ;;  %v2519_v41 = vld [vmem:[#allocation2 + $0x174] ss:$8 sps:$4 sm:$0xff]   ;;  %v2522_v43 = vld [vmem:[#allocation2 + $0x64] ss:$8 sps:$4 sm:$0xff]   ;;  %v2825_v45 = vpack.c.bf16 %v64_v40, %v63_v39  ;;  %v2523_v48 = vld [vmem:[#allocation2 + $0x50] ss:$8 sps:$4 sm:$0xff]  }
  0x1a   :  { %v2525_v46 = vld [vmem:[#allocation2 + $0x54] ss:$8 sps:$4 sm:$0xff]   ;;  %v49_v47 = vld [vmem:[%s3594_s0 + $0x40] sm:$0xff]  ;;  %v50_v49 = vld [vmem:[%s3594_s0 + $0x48] sm:$0xff] }
  0x1b   :  { %v65_v50 = vld [vmem:[%s3594_s0 + $0xc0] sm:$0xff]  ;;  %v66_v51 = vld [vmem:[%s3594_s0 + $0xc8] sm:$0xff]  ;;  %v2845_v54 = vpack.c.bf16 %v50_v49, %v49_v47  ;;  %v2534_v56 = vld [vmem:[#allocation2 + $0x34] ss:$8 sps:$4 sm:$0xff]  }
  0x1c   :  { %271 = vmatpush1.bf16.msra.mxu0 %v2501_v8  ;;  %2485 = vmatpush1.bf16.msra.mxu1 %v2501_v8  ;;  %v2529_v52 = vld [vmem:[#allocation2 + $0x40] ss:$8 sps:$4 sm:$0xff]   ;;  %v2531_v53 = vld [vmem:[#allocation2 + $0x44] ss:$8 sps:$4 sm:$0xff]   ;;  %v2847_v55 = vpack.c.bf16 %v66_v51, %v65_v50  ;;  %v51_v57 = vld [vmem:[%s3594_s0 + $0x50] sm:$0xff] }
  0x1d   :  { %457 = vmatprep.subr.bf16.mxu1 %v2504_v13  ;;  %1358 = vmatprep.subr.bf16.mxu0 %v2516_v35  ;;  %v2532_v58 = vld [vmem:[#allocation2 + $0x30] ss:$8 sps:$4 sm:$0xff]   ;;  %v2538_v62 = vld [vmem:[#allocation2 + $0x20] ss:$8 sps:$4 sm:$0xff]   ;;  %v2540_v63 = vld [vmem:[#allocation2 + $0x24] ss:$8 sps:$4 sm:$0xff]  }
  0x1e   :  { %v52_v59 = vld [vmem:[%s3594_s0 + $0x58] sm:$0xff]  ;;  %v67_v60 = vld [vmem:[%s3594_s0 + $0xd0] sm:$0xff]  ;;  %v53_v4 = vld [vmem:[%s3594_s0 + $0x60] sm:$0xff] }
  0x1f   :  { %2253 = vmatmul.mubr.msk.bf16.vlgmr.msra.gmra.mxu0 %vm207_vm0, %v2736_v14  ;;  %2261 = vmatmul.mubr.msk.bf16.vlgmr.msra.gmra.mxu1 %vm207_vm0, %v2738_v15  ;;  %v68_v61 = vld [vmem:[%s3594_s0 + $0xd8] sm:$0xff]  ;;  %v2867_v1 = vpack.c.bf16 %v52_v59, %v51_v57  ;;  %v54_v6 = vld [vmem:[%s3594_s0 + $0x68] sm:$0xff]  ;;  %v69_v7 = vld [vmem:[%s3594_s0 + $0xe0] sm:$0xff] }
  0x20   :  { %458 = vmatpush1.bf16.msra.mxu1 %v2502_v16  ;;  %298 = vmatprep.mubr.bf16.mxu0 %v2651_v0  ;;  %v2869_v2 = vpack.c.bf16 %v68_v61, %v67_v60  ;;  %v2543_v3 = vld [vmem:[#allocation2 + $0x14] ss:$8 sps:$4 sm:$0xff]   ;;  %v2541_v5 = vld [vmem:[#allocation2 + $0x10] ss:$8 sps:$4 sm:$0xff]   ;;  %v70_v8 = vld [vmem:[%s3594_s0 + $0xe8] sm:$0xff]  ;;  %v2889_v11 = vpack.c.bf16 %v54_v6, %v53_v4  ;;  %v107_v4 = vlaneseq }
  0x21   :  { %378 = vmatprep.mubr.bf16.mxu1 %v2651_v0  ;;  %459 = vmatprep.subr.bf16.mxu1 %v2507_v17  ;;  %v2549_v9 = vld [vmem:[#allocation2 + $0x4] ss:$8 sps:$4 sm:$0xff]   ;;  %v2547_v10 = vld [vmem:[#allocation2] ss:$8 sps:$4 sm:$0xff]   ;;  %v2891_v12 = vpack.c.bf16 %v70_v8, %v69_v7  ;;  %v2552_v13 = vld [vmem:[#allocation2 + $0xf4] ss:$8 sps:$4 sm:$0xff]  }
  0x22   :  { %1359 = vmatpush1.bf16.msra.mxu0 %v2514_v38  ;;  %v2550_v16 = vld [vmem:[#allocation2 + $0xf0] ss:$8 sps:$4 sm:$0xff]   ;;  %v2558_v21 = vld [vmem:[#allocation2 + $0xe4] ss:$8 sps:$4 sm:$0xff]   ;;  %v2565_v30 = vld [vmem:[#allocation2 + $0xc0] ss:$8 sps:$4 sm:$0xff]  }
  0x23   :  { %1360 = vmatprep.subr.bf16.mxu0 %v2522_v43  ;;  %v55_v17 = vld [vmem:[%s3594_s0 + $0x70] sm:$0xff]  ;;  %v56_v18 = vld [vmem:[%s3594_s0 + $0x78] sm:$0xff]  ;;  %v2567_v29 = vld [vmem:[#allocation2 + $0xc4] ss:$8 sps:$4 sm:$0xff]  }
  0x24   :  { %460 = vmatpush1.bf16.msra.mxu1 %v2505_v22  ;;  %v71_v19 = vld [vmem:[%s3594_s0 + $0xf0] sm:$0xff]  ;;  %v72_v20 = vld [vmem:[%s3594_s0 + $0xf8] sm:$0xff]  ;;  %v2556_v22 = vld [vmem:[#allocation2 + $0xe0] ss:$8 sps:$4 sm:$0xff]  }
  0x25   :  { %461 = vmatprep.subr.bf16.mxu1 %v2510_v23  ;;  %v2911_v23 = vpack.c.bf16 %v56_v18, %v55_v17  ;;  %v2559_v28 = vld [vmem:[#allocation2 + $0xd0] ss:$8 sps:$4 sm:$0xff]   ;;  %v2570_v35 = vld [vmem:[#allocation2 + $0xb4] ss:$8 sps:$4 sm:$0xff]   ;;  %v2526_v37 = vld [vmem:[#allocation2 + $0x160] ss:$8 sps:$4 sm:$0xff]  }
  0x26   :  { %1361 = vmatpush1.bf16.msra.mxu0 %v2520_v42  ;;  %v2517_v31 = vld [vmem:[#allocation2 + $0x170] ss:$8 sps:$4 sm:$0xff]   ;;  %v2537_v38 = vld [vmem:[#allocation2 + $0x154] ss:$8 sps:$4 sm:$0xff]   ;;  %v2576_v39 = vld [vmem:[#allocation2 + $0xa4] ss:$8 sps:$4 sm:$0xff]  }
  0x27   :  { %2254 = vmatmul.mubr.msk.bf16.gmra.mxu0 %vm207_vm0, %v2770_v24  ;;  %2262 = vmatmul.mubr.msk.bf16.gmra.mxu1 %vm207_vm0, %v2772_v25  ;;  %v2568_v36 = vld [vmem:[#allocation2 + $0xb0] ss:$8 sps:$4 sm:$0xff]   ;;  %v2574_v40 = vld [vmem:[#allocation2 + $0xa0] ss:$8 sps:$4 sm:$0xff]   ;;  %v2546_v42 = vld [vmem:[#allocation2 + $0x144] ss:$8 sps:$4 sm:$0xff]  }
  0x28   :  { %308 = vmatprep.mubr.bf16.mxu0 %v2651_v0  ;;  %388 = vmatprep.mubr.bf16.mxu1 %v2651_v0  ;;  %v2579_v43 = vld [vmem:[#allocation2 + $0x94] ss:$8 sps:$4 sm:$0xff]   ;;  %v2583_v49 = vld [vmem:[#allocation2 + $0x80] ss:$8 sps:$4 sm:$0xff]   ;;  %v2553_v50 = vld [vmem:[#allocation2 + $0x130] ss:$8 sps:$4 sm:$0xff]  }
  0x29   :  { %462 = vmatpush1.bf16.msra.mxu1 %v2508_v26  ;;  %1362 = vmatprep.subr.bf16.mxu0 %v2525_v46  ;;  %v2913_v26 = vpack.c.bf16 %v72_v20, %v71_v19  ;;  %v2544_v46 = vld [vmem:[#allocation2 + $0x140] ss:$8 sps:$4 sm:$0xff]   ;;  %v2555_v47 = vld [vmem:[#allocation2 + $0x134] ss:$8 sps:$4 sm:$0xff]   ;;  %v2564_v51 = vld [vmem:[#allocation2 + $0x124] ss:$8 sps:$4 sm:$0xff]  }
  0x2a   :  { %463 = vmatprep.subr.bf16.mxu1 %v2513_v27  ;;  %1363 = vmatpush1.bf16.msra.mxu0 %v2523_v48  ;;  %v2561_v27 = vld [vmem:[#allocation2 + $0xd4] ss:$8 sps:$4 sm:$0xff]   ;;  %v2585_v48 = vld [vmem:[#allocation2 + $0x84] ss:$8 sps:$4 sm:$0xff]   ;;  %v2580_v57 = vld [vmem:[#allocation2 + $0x100] ss:$8 sps:$4 sm:$0xff]  }
  0x2b   :  { %1364 = vmatprep.subr.bf16.mxu0 %v2531_v53  ;;  %v2571_v53 = vld [vmem:[#allocation2 + $0x110] ss:$8 sps:$4 sm:$0xff]   ;;  %v2591_v59 = vld [vmem:[#allocation2 + $0x1e4] ss:$8 sps:$4 sm:$0xff]   ;;  %v2589_v60 = vld [vmem:[#allocation2 + $0x1e0] ss:$8 sps:$4 sm:$0xff]  }
  0x2c   :  { %v2594_v61 = vld [vmem:[#allocation2 + $0x1d4] ss:$8 sps:$4 sm:$0xff]   ;;  %v2603_v6 = vld [vmem:[#allocation2 + $0x1a4] ss:$8 sps:$4 sm:$0xff]   ;;  %v2950_v8 = vld [vmem:[%s3596_s2] sm:$0xf] }
  0x2d   :  { %464 = vmatpush1.bf16.msra.mxu1 %v2511_v32  ;;  %v2528_v32 = vld [vmem:[#allocation2 + $0x164] ss:$8 sps:$4 sm:$0xff]  }
  0x2e   :  { %1551 = vmatprep.subr.bf16.mxu1 %v2519_v41  ;;  %1365 = vmatpush1.bf16.msra.mxu0 %v2529_v52  ;;  %v2535_v41 = vld [vmem:[#allocation2 + $0x150] ss:$8 sps:$4 sm:$0xff]   ;;  %v2573_v52 = vld [vmem:[#allocation2 + $0x114] ss:$8 sps:$4 sm:$0xff]  }
  0x2f   :  { %2255 = vmatmul.mubr.msk.bf16.gmra.mxu0 %vm207_vm0, %v2801_v33  ;;  %2263 = vmatmul.mubr.msk.bf16.gmra.mxu1 %vm207_vm0, %v2803_v34 }
  0x30   :  { %318 = vmatprep.mubr.bf16.mxu0 %v2651_v0  ;;  %398 = vmatprep.mubr.bf16.mxu1 %v2651_v0 }
  0x31   :  { %1366 = vmatprep.subr.bf16.mxu0 %v2534_v56  ;;  %v2582_v56 = vld [vmem:[#allocation2 + $0x104] ss:$8 sps:$4 sm:$0xff]  }
  0x32   :  { %1367 = vmatpush1.bf16.msra.mxu0 %v2532_v58  ;;  %v2588_v58 = vld [vmem:[#allocation2 + $0x1f4] ss:$8 sps:$4 sm:$0xff]  }
  0x33   :  { %1368 = vmatprep.subr.bf16.mxu0 %v2540_v63  ;;  %v2597_v63 = vld [vmem:[#allocation2 + $0x1c4] ss:$8 sps:$4 sm:$0xff]  }
  0x36   :  { %1369 = vmatpush1.bf16.msra.mxu0 %v2538_v62  ;;  %v2595_v62 = vld [vmem:[#allocation2 + $0x1c0] ss:$8 sps:$4 sm:$0xff]  }
  0x37   :  { %2256 = vmatmul.mubr.msk.bf16.gmra.mxu0 %vm207_vm0, %v2823_v44  ;;  %2264 = vmatmul.mubr.msk.bf16.gmra.mxu1 %vm207_vm0, %v2825_v45 }
  0x38   :  { %328 = vmatprep.mubr.bf16.mxu0 %v2651_v0  ;;  %408 = vmatprep.mubr.bf16.mxu1 %v2651_v0 }
  0x39   :  { %1370 = vmatprep.subr.bf16.mxu0 %v2543_v3  ;;  %v2600_v3 = vld [vmem:[#allocation2 + $0x1b4] ss:$8 sps:$4 sm:$0xff]  }
  0x3a   :  { %1371 = vmatpush1.bf16.msra.mxu0 %v2541_v5  ;;  %v2601_v5 = vld [vmem:[#allocation2 + $0x1a0] ss:$8 sps:$4 sm:$0xff]  }
  0x3b   :  { %1372 = vmatprep.subr.bf16.mxu0 %v2549_v9 }
  0x3e   :  { %1373 = vmatpush1.bf16.msra.mxu0 %v2547_v10  ;;  %v2604_v10 = vld [vmem:[#allocation2 + $0x190] ss:$8 sps:$4 sm:$0xff]  }
  0x3f   :  { %2257 = vmatmul.mubr.msk.bf16.gmra.mxu0 %vm207_vm0, %v2845_v54  ;;  %2265 = vmatmul.mubr.msk.bf16.gmra.mxu1 %vm207_vm0, %v2847_v55 }
  0x40   :  { %338 = vmatprep.mubr.bf16.mxu0 %v2651_v0  ;;  %418 = vmatprep.mubr.bf16.mxu1 %v2651_v0 }
  0x41   :  { %1374 = vmatprep.subr.bf16.mxu0 %v2552_v13  ;;  %v2609_v13 = vld [vmem:[#allocation2 + $0x184] ss:$8 sps:$4 sm:$0xff]  }
  0x42   :  { %1375 = vmatpush2.bf16.msra.mxu0 %v2550_v16  ;;  %v2607_v16 = vld [vmem:[#allocation2 + $0x180] ss:$8 sps:$4 sm:$0xff]  }
  0x43   :  { %1376 = vmatprep.subr.bf16.mxu0 %v2558_v21 }
  0x46   :  { %1377 = vmatpush2.bf16.msra.mxu0 %v2556_v22 }
  0x47   :  { %2258 = vmatmul.mubr.msk.bf16.gmra.mxu0 %vm207_vm0, %v2867_v1  ;;  %2266 = vmatmul.mubr.msk.bf16.gmra.mxu1 %vm207_vm0, %v2869_v2 }
  0x48   :  { %348 = vmatprep.mubr.bf16.mxu0 %v2651_v0  ;;  %428 = vmatprep.mubr.bf16.mxu1 %v2651_v0 }
  0x49   :  { %1378 = vmatprep.subr.bf16.mxu0 %v2561_v27 }
  0x4a   :  { %1379 = vmatpush2.bf16.msra.mxu0 %v2559_v28 }
  0x4b   :  { %1380 = vmatprep.subr.bf16.mxu0 %v2567_v29 }
  0x4e   :  { %1381 = vmatpush2.bf16.msra.mxu0 %v2565_v30 }
  0x4f   :  { %2259 = vmatmul.mubr.msk.bf16.gmra.mxu0 %vm207_vm0, %v2889_v11  ;;  %2267 = vmatmul.mubr.msk.bf16.gmra.mxu1 %vm207_vm0, %v2891_v12 }
  0x50   :  { %358 = vmatprep.mubr.bf16.mxu0 %v2651_v0  ;;  %438 = vmatprep.mubr.bf16.mxu1 %v2651_v0 }
  0x51   :  { %1382 = vmatprep.subr.bf16.mxu0 %v2570_v35 }
  0x52   :  { %1383 = vmatpush2.bf16.msra.mxu0 %v2568_v36 }
  0x53   :  { %1384 = vmatprep.subr.bf16.mxu0 %v2576_v39 }
  0x56   :  { %1385 = vmatpush2.bf16.msra.mxu0 %v2574_v40 }
  0x57   :  { %2260 = vmatmul.mubr.msk.bf16.gmra.mxu0 %vm207_vm0, %v2911_v23  ;;  %2268 = vmatmul.mubr.msk.bf16.gmra.mxu1 %vm207_vm0, %v2913_v26 }
  0x58   :  { %481 = vmatprep.mubr.bf16.mxu1 %v2651_v0  ;;  %1386 = vmatprep.subr.bf16.mxu0 %v2579_v43 }
  0x5f   :  { %2269 = vmatmul.mubr.msk.bf16.vlgmr.msra.gmra.mxu1 %vm207_vm0, %v2736_v14  ;;  %v2577_v14 = vld [vmem:[#allocation2 + $0x90] ss:$8 sps:$4 sm:$0xff]  }
  0x60   :  { %491 = vmatprep.mubr.bf16.mxu1 %v2651_v0  ;;  %1552 = vmatpush1.bf16.msra.mxu1 %v2517_v31 }
  0x61   :  { %1553 = vmatprep.subr.bf16.mxu1 %v2528_v32  ;;  %1387 = vmatpush2.bf16.msra.mxu0 %v2577_v14 }
  0x62   :  { %1388 = vmatprep.subr.bf16.mxu0 %v2585_v48 }
  0x64   :  { %1554 = vmatpush1.bf16.msra.mxu1 %v2526_v37 }
  0x65   :  { %1555 = vmatprep.subr.bf16.mxu1 %v2537_v38  ;;  %1389 = vmatpush2.bf16.msra.mxu0 %v2583_v49 }
  0x67   :  { %2270 = vmatmul.mubr.msk.bf16.gmra.mxu1 %vm207_vm0, %v2770_v24  ;;  %v2562_v24 = vld [vmem:[#allocation2 + $0x120] ss:$8 sps:$4 sm:$0xff]  }
  0x68   :  { %501 = vmatprep.mubr.bf16.mxu1 %v2651_v0  ;;  %1556 = vmatpush1.bf16.msra.mxu1 %v2535_v41 }
  0x69   :  { %1557 = vmatprep.subr.bf16.mxu1 %v2546_v42 }
  0x6c   :  { %1558 = vmatpush1.bf16.msra.mxu1 %v2544_v46 }
  0x6d   :  { %1559 = vmatprep.subr.bf16.mxu1 %v2555_v47 }
  0x6f   :  { %2271 = vmatmul.mubr.msk.bf16.gmra.mxu1 %vm207_vm0, %v2801_v33  ;;  %v2586_v33 = vld [vmem:[#allocation2 + $0x1f0] ss:$8 sps:$4 sm:$0xff]  }
  0x70   :  { %511 = vmatprep.mubr.bf16.mxu1 %v2651_v0  ;;  %1560 = vmatpush1.bf16.msra.mxu1 %v2553_v50 }
  0x71   :  { %1561 = vmatprep.subr.bf16.mxu1 %v2564_v51 }
  0x74   :  { %1562 = vmatpush1.bf16.msra.mxu1 %v2562_v24 }
  0x75   :  { %1563 = vmatprep.subr.bf16.mxu1 %v2573_v52 }
  0x77   :  { %2272 = vmatmul.mubr.msk.bf16.gmra.mxu1 %vm207_vm0, %v2823_v44  ;;  %v2592_v44 = vld [vmem:[#allocation2 + $0x1d0] ss:$8 sps:$4 sm:$0xff]  }
  0x78   :  { %521 = vmatprep.mubr.bf16.mxu1 %v2651_v0  ;;  %1564 = vmatpush1.bf16.msra.mxu1 %v2571_v53 }
  0x79   :  { %1565 = vmatprep.subr.bf16.mxu1 %v2582_v56 }
  0x7c   :  { %1566 = vmatpush1.bf16.msra.mxu1 %v2580_v57 }
  0x7d   :  { %1567 = vmatprep.subr.bf16.mxu1 %v2588_v58 }
  0x7f   :  { %2273 = vmatmul.mubr.msk.bf16.gmra.mxu1 %vm207_vm0, %v2845_v54  ;;  %v2598_v54 = vld [vmem:[#allocation2 + $0x1b0] ss:$8 sps:$4 sm:$0xff]  }
  0x80   :  { %531 = vmatprep.mubr.bf16.mxu1 %v2651_v0  ;;  %1568 = vmatpush2.bf16.msra.mxu1 %v2586_v33 }
  0x81   :  { %1569 = vmatprep.subr.bf16.mxu1 %v2591_v59 }
  0x84   :  { %1570 = vmatpush2.bf16.msra.mxu1 %v2589_v60 }
  0x85   :  { %1571 = vmatprep.subr.bf16.mxu1 %v2594_v61 }
  0x87   :  { %2274 = vmatmul.mubr.msk.bf16.gmra.mxu1 %vm207_vm0, %v2867_v1  ;;  %v2944_v1 = vshrl.u32 %v107_v4, 7 }
  0x88   :  { %541 = vmatprep.mubr.bf16.mxu1 %v2651_v0  ;;  %1572 = vmatpush2.bf16.msra.mxu1 %v2592_v44 }
  0x89   :  { %1573 = vmatprep.subr.bf16.mxu1 %v2597_v63  ;;  %v117_v7 = vsub.s32 2, %v2944_v1 }
  0x8b   :  { %v2955_v9 = vrot.slane %v2950_v8, %v117_v7 }
  0x8c   :  { %1574 = vmatpush2.bf16.msra.mxu1 %v2595_v62 }
  0x8d   :  { %1575 = vmatprep.subr.bf16.mxu1 %v2600_v3 }
  0x8f   :  { %2275 = vmatmul.mubr.msk.bf16.gmra.mxu1 %vm207_vm0, %v2889_v11  ;;  %v2606_v11 = vld [vmem:[#allocation2 + $0x194] ss:$8 sps:$4 sm:$0xff]  }
  0x90   :  { %551 = vmatprep.mubr.bf16.mxu1 %v2651_v0  ;;  %1576 = vmatpush2.bf16.msra.mxu1 %v2598_v54 }
  0x91   :  { %1577 = vmatprep.subr.bf16.mxu1 %v2603_v6 }
  0x94   :  { %1578 = vmatpush2.bf16.msra.mxu1 %v2601_v5 }
  0x95   :  { %1579 = vmatprep.subr.bf16.mxu1 %v2606_v11 }
  0x97   :  { %2276 = vmatmul.mubr.msk.bf16.gmra.mxu1 %vm207_vm0, %v2911_v23 }
  0x98   :  { %561 = vmatprep.mubr.bf16.mxu1 %v2651_v0  ;;  %1580 = vmatpush2.bf16.msra.mxu1 %v2604_v10 }
  0x99   :  { %1581 = vmatprep.subr.bf16.mxu1 %v2609_v13 }
  0x9c   :  { %1582 = vmatpush2.bf16.msra.mxu1 %v2607_v16 }
  0x9f   :  { %2277 = vmatmul.mubr.msk.bf16.gmra.mxu1 %vm207_vm0, %v2738_v15  ;;  %v109_v15 = vsub.s32 0, %v2944_v1 }
  0xa0   :  { %571 = vmatprep.mubr.bf16.mxu1 %v2651_v0 }
  0xa7   :  { %2278 = vmatmul.mubr.msk.bf16.gmra.mxu1 %vm207_vm0, %v2772_v25  ;;  %v2982_v25 = vrot.slane %v2950_v8, %v109_v15 }
  0xa8   :  { %581 = vmatprep.mubr.bf16.mxu1 %v2651_v0 }
  0xaf   :  { %2279 = vmatmul.mubr.msk.bf16.gmra.mxu1 %vm207_vm0, %v2803_v34  ;;  %v113_v34 = vsub.s32 1, %v2944_v1 }
  0xb0   :  { %591 = vmatprep.mubr.bf16.mxu1 %v2651_v0 }
  0xb7   :  { %2280 = vmatmul.mubr.msk.bf16.gmra.mxu1 %vm207_vm0, %v2825_v45 }
  0xb8   :  { %601 = vmatprep.mubr.bf16.mxu1 %v2651_v0 }
  0xbf   :  { %2281 = vmatmul.mubr.msk.bf16.gmra.mxu1 %vm207_vm0, %v2847_v55 }
  0xc0   :  { %611 = vmatprep.mubr.bf16.mxu1 %v2651_v0 }
  0xc7   :  { %2282 = vmatmul.mubr.msk.bf16.gmra.mxu1 %vm207_vm0, %v2869_v2 }
  0xc8   :  { %621 = vmatprep.mubr.bf16.mxu1 %v2651_v0 }
  0xcf   :  { %2283 = vmatmul.mubr.msk.bf16.gmra.mxu1 %vm207_vm0, %v2891_v12 }
  0xd0   :  { %631 = vmatprep.mubr.bf16.mxu1 %v2651_v0  ;;  %v2990_v0 = vrot.slane %v2950_v8, %v113_v34 }
  0xd7   :  { %2284 = vmatmul.mubr.msk.bf16.gmra.mxu1 %vm207_vm0, %v2913_v26 }
  0xdf   :  { %v290_v45 = vpop.f32.mrf.mxu0  ;;  %v370_v55 = vpop.f32.mrf.mxu1 }
  0xe0   :  { %v291_v2 = vadd.f32 %v290_v45, %v2982_v25  ;;  %v371_v12 = vadd.f32 %v370_v55, %v2982_v25 }
  0xe1   :  { %v292_v17 = vpop.f32.mrf.mxu0  ;;  %v2992_v18 = vpop.f32.mrf.mxu1 }
  0xe2   :  { %v293_v19 = vadd.f32 %v292_v17, %v2990_v0  ;;  %v642_v22 = vmul.f32 0.2, %v291_v2  ;;  %v706_v23 = vmul.f32 0.2, %v371_v12 }
  0xe3   :  { %v294_v20 = vpop.f32.mrf.mxu0  ;;  %v374_v21 = vpop.f32.mrf.mxu1 }
  0xe4   :  { %v643_v26 = vmul.f32 0.2, %v293_v19  ;;  %v295_v27 = vadd.f32 %v294_v20, %v2982_v25  ;;  %v375_v28 = vadd.f32 %v374_v21, %v2982_v25  ;;  %v770_v38 = vmax.f32 %v291_v2, %v642_v22 }
  0xe5   :  { %v296_v29 = vpop.f32.mrf.mxu0  ;;  %v2997_v30 = vpop.f32.mrf.mxu1  ;;  %v834_v42 = vmax.f32 %v371_v12, %v706_v23 }
  0xe6   :  { %v297_v31 = vadd.f32 %v296_v29, %v2990_v0  ;;  %v646_v32 = vmul.f32 0.2, %v295_v27  ;;  %v710_v35 = vmul.f32 0.2, %v375_v28  ;;  %v771_v43 = vmax.f32 %v293_v19, %v643_v26 }
  0xe7   :  { %v300_v36 = vpop.f32.mrf.mxu0  ;;  %v380_v37 = vpop.f32.mrf.mxu1 }
  0xe8   :  { %v647_v39 = vmul.f32 0.2, %v297_v31  ;;  %v301_v40 = vadd.f32 %v300_v36, %v2982_v25  ;;  %v381_v41 = vadd.f32 %v380_v37, %v2982_v25  ;;  %v774_v14 = vmax.f32 %v295_v27, %v646_v32 }
  0xe9   :  { %v838_v46 = vmax.f32 %v375_v28, %v710_v35  ;;  %v302_v47 = vpop.f32.mrf.mxu0  ;;  %v3002_v48 = vpop.f32.mrf.mxu1 }
  0xea   :  { %v775_v49 = vmax.f32 %v297_v31, %v647_v39  ;;  %v303_v50 = vadd.f32 %v302_v47, %v2990_v0  ;;  %v898_v53 = vpack.c.bf16 %v774_v14, %v770_v38  ;;  %v650_v56 = vmul.f32 0.2, %v301_v40 }
  0xeb   :  { %v304_v51 = vpop.f32.mrf.mxu0  ;;  %v384_v24 = vpop.f32.mrf.mxu1  ;;  %v3005_v52 = vpack.c.bf16 %v838_v46, %v834_v42  ;;  %v714_v33 = vmul.f32 0.2, %v381_v41 }
  0xec   :  { %v305_v57 = vadd.f32 %v304_v51, %v2982_v25  ;;  %v385_v58 = vadd.f32 %v384_v24, %v2982_v25  ;;  %v651_v59 = vmul.f32 0.2, %v303_v50  ;;  %v899_v61 = vpack.c.bf16 %v775_v49, %v771_v43 }
  0xed   :  { %v306_v60 = vpop.f32.mrf.mxu0  ;;  %v3009_v44 = vpop.f32.mrf.mxu1  ;;  %v778_v5 = vmax.f32 %v301_v40, %v650_v56  ;;  %v842_v11 = vmax.f32 %v381_v41, %v714_v33 }
  0xee   :  { %v654_v62 = vmul.f32 0.2, %v305_v57  ;;  %v718_v63 = vmul.f32 0.2, %v385_v58  ;;  %v307_v54 = vadd.f32 %v306_v60, %v2990_v0  ;;  %1390 = vmatprep.mubr.bf16.mxu0 %v899_v61  ;;  %v779_v13 = vmax.f32 %v303_v50, %v651_v59 }
  0xef   :  { %v310_v3 = vpop.f32.mrf.mxu0  ;;  %v390_v4 = vpop.f32.mrf.mxu1  ;;  %1391 = vmatmul.mubr.bf16.vlgmr.msra.gmra.mxu0 %v898_v53 }
  0xf0   :  { %v782_v6 = vmax.f32 %v305_v57, %v654_v62  ;;  %v846_v7 = vmax.f32 %v385_v58, %v718_v63  ;;  %v655_v10 = vmul.f32 0.2, %v307_v54  ;;  %v311_v16 = vadd.f32 %v310_v3, %v2982_v25 }
  0xf1   :  { %v391_v45 = vadd.f32 %v390_v4, %v2982_v25  ;;  %v312_v55 = vpop.f32.mrf.mxu0  ;;  %v3014_v2 = vpop.f32.mrf.mxu1 }
  0xf2   :  { %v783_v12 = vmax.f32 %v307_v54, %v655_v10  ;;  %v313_v17 = vadd.f32 %v312_v55, %v2990_v0  ;;  %v658_v19 = vmul.f32 0.2, %v311_v16  ;;  %v3017_v22 = vpack.c.bf16 %v846_v7, %v842_v11 }
  0xf3   :  { %v314_v20 = vpop.f32.mrf.mxu0  ;;  %v394_v21 = vpop.f32.mrf.mxu1  ;;  %v902_v27 = vpack.c.bf16 %v782_v6, %v778_v5  ;;  %v722_v28 = vmul.f32 0.2, %v391_v45 }
  0xf4   :  { %v315_v23 = vadd.f32 %v314_v20, %v2982_v25  ;;  %v395_v26 = vadd.f32 %v394_v21, %v2982_v25  ;;  %v659_v29 = vmul.f32 0.2, %v313_v17  ;;  %v903_v35 = vpack.c.bf16 %v783_v12, %v779_v13 }
  0xf5   :  { %v316_v31 = vpop.f32.mrf.mxu0  ;;  %v3021_v32 = vpop.f32.mrf.mxu1  ;;  %v786_v38 = vmax.f32 %v311_v16, %v658_v19  ;;  %v850_v47 = vmax.f32 %v391_v45, %v722_v28 }
  0xf6   :  { %v662_v36 = vmul.f32 0.2, %v315_v23  ;;  %v726_v37 = vmul.f32 0.2, %v395_v26  ;;  %v317_v39 = vadd.f32 %v316_v31, %v2990_v0  ;;  %1400 = vmatprep.mubr.bf16.mxu0 %v903_v35  ;;  %v787_v49 = vmax.f32 %v313_v17, %v659_v29 }
  0xf7   :  { %v320_v40 = vpop.f32.mrf.mxu0  ;;  %v400_v41 = vpop.f32.mrf.mxu1  ;;  %1401 = vmatmul.mubr.bf16.gmra.mxu0 %v902_v27 }
  0xf8   :  { %v790_v42 = vmax.f32 %v315_v23, %v662_v36  ;;  %v854_v43 = vmax.f32 %v395_v26, %v726_v37  ;;  %v321_v14 = vadd.f32 %v320_v40, %v2982_v25  ;;  %v401_v46 = vadd.f32 %v400_v41, %v2982_v25  ;;  %v2610_v40 = vld [vmem:[%s3599_s5 + $0x78] sm:$0xff]  }
  0xf9   :  { %v663_v50 = vmul.f32 0.2, %v317_v39  ;;  %v322_v51 = vpop.f32.mrf.mxu0  ;;  %v3026_v24 = vpop.f32.mrf.mxu1  ;;  %v2611_v41 = vld [vmem:[%s3599_s5 + $0x38] sm:$0xff]   ;;  %2366 = vmatprep.subr.bf16.mxu0 %v2610_v40 }
  0xfa   :  { %v323_v53 = vadd.f32 %v322_v51, %v2990_v0  ;;  %v3029_v33 = vpack.c.bf16 %v854_v43, %v850_v47  ;;  %v666_v59 = vmul.f32 0.2, %v321_v14  ;;  %v730_v60 = vmul.f32 0.2, %v401_v46  ;;  %2367 = vmatpush3.bf16.msra.mxu0 %v2611_v41 }
  0xfb   :  { %v791_v56 = vmax.f32 %v317_v39, %v663_v50  ;;  %v324_v57 = vpop.f32.mrf.mxu0  ;;  %v404_v58 = vpop.f32.mrf.mxu1  ;;  %v906_v61 = vpack.c.bf16 %v790_v42, %v786_v38 }
  0xfc   :  { %v667_v62 = vmul.f32 0.2, %v323_v53  ;;  %v325_v63 = vadd.f32 %v324_v57, %v2982_v25  ;;  %v405_v54 = vadd.f32 %v404_v58, %v2982_v25  ;;  %v794_v16 = vmax.f32 %v321_v14, %v666_v59 }
  0xfd   :  { %v326_v3 = vpop.f32.mrf.mxu0  ;;  %v3033_v4 = vpop.f32.mrf.mxu1  ;;  %v907_v5 = vpack.c.bf16 %v791_v56, %v787_v49  ;;  %v858_v17 = vmax.f32 %v401_v46, %v730_v60 }
  0xfe   :  { %v327_v6 = vadd.f32 %v326_v3, %v2990_v0  ;;  %v670_v7 = vmul.f32 0.2, %v325_v63  ;;  %v734_v10 = vmul.f32 0.2, %v405_v54  ;;  %v795_v19 = vmax.f32 %v323_v53, %v667_v62 }
  0xff   :  { %1410 = vmatprep.mubr.bf16.mxu0 %v907_v5  ;;  %v330_v11 = vpop.f32.mrf.mxu0  ;;  %v410_v13 = vpop.f32.mrf.mxu1 }
 0x100   :  { %v671_v45 = vmul.f32 0.2, %v327_v6  ;;  %v331_v55 = vadd.f32 %v330_v11, %v2982_v25  ;;  %v411_v12 = vadd.f32 %v410_v13, %v2982_v25  ;;  %1411 = vmatmul.mubr.bf16.gmra.mxu0 %v906_v61  ;;  %v798_v20 = vmax.f32 %v325_v63, %v670_v7 }
 0x101   :  { %v862_v21 = vmax.f32 %v405_v54, %v734_v10  ;;  %v332_v23 = vpop.f32.mrf.mxu0  ;;  %v3038_v26 = vpop.f32.mrf.mxu1 }
 0x102   :  { %v799_v27 = vmax.f32 %v327_v6, %v671_v45  ;;  %v333_v28 = vadd.f32 %v332_v23, %v2990_v0  ;;  %v674_v36 = vmul.f32 0.2, %v331_v55  ;;  %v910_v39 = vpack.c.bf16 %v798_v20, %v794_v16 }
 0x103   :  { %v334_v29 = vpop.f32.mrf.mxu0  ;;  %v414_v31 = vpop.f32.mrf.mxu1  ;;  %v3041_v35 = vpack.c.bf16 %v862_v21, %v858_v17  ;;  %v738_v42 = vmul.f32 0.2, %v411_v12 }
 0x104   :  { %v335_v37 = vadd.f32 %v334_v29, %v2982_v25  ;;  %v415_v38 = vadd.f32 %v414_v31, %v2982_v25  ;;  %v675_v43 = vmul.f32 0.2, %v333_v28  ;;  %v911_v47 = vpack.c.bf16 %v799_v27, %v795_v19 }
 0x105   :  { %v336_v14 = vpop.f32.mrf.mxu0  ;;  %v3051_v46 = vpop.f32.mrf.mxu1  ;;  %v802_v57 = vmax.f32 %v331_v55, %v674_v36  ;;  %v866_v61 = vmax.f32 %v411_v12, %v738_v42 }
 0x106   :  { %v678_v49 = vmul.f32 0.2, %v335_v37  ;;  %v742_v50 = vmul.f32 0.2, %v415_v38  ;;  %v337_v51 = vadd.f32 %v336_v14, %v2990_v0  ;;  %1420 = vmatprep.mubr.bf16.mxu0 %v911_v47  ;;  %v803_v62 = vmax.f32 %v333_v28, %v675_v43 }
 0x107   :  { %v340_v53 = vpop.f32.mrf.mxu0  ;;  %v420_v56 = vpop.f32.mrf.mxu1 }
 0x108   :  { %v806_v58 = vmax.f32 %v335_v37, %v678_v49  ;;  %v870_v59 = vmax.f32 %v415_v38, %v742_v50  ;;  %v679_v60 = vmul.f32 0.2, %v337_v51  ;;  %1421 = vmatmul.mubr.bf16.gmra.mxu0 %v910_v39  ;;  %v341_v63 = vadd.f32 %v340_v53, %v2982_v25 }
 0x109   :  { %v421_v54 = vadd.f32 %v420_v56, %v2982_v25  ;;  %v342_v3 = vpop.f32.mrf.mxu0  ;;  %v3056_v5 = vpop.f32.mrf.mxu1 }
 0x10a   :  { %v807_v6 = vmax.f32 %v337_v51, %v679_v60  ;;  %v343_v7 = vadd.f32 %v342_v3, %v2990_v0  ;;  %v682_v10 = vmul.f32 0.2, %v341_v63  ;;  %v3059_v16 = vpack.c.bf16 %v870_v59, %v866_v61  ;;  %v2612_v61 = vld [vmem:[%s3599_s5 + $0x70] sm:$0xff]  }
 0x10b   :  { %v344_v11 = vpop.f32.mrf.mxu0  ;;  %v424_v13 = vpop.f32.mrf.mxu1  ;;  %v914_v12 = vpack.c.bf16 %v806_v58, %v802_v57  ;;  %v746_v17 = vmul.f32 0.2, %v421_v54  ;;  %2368 = vmatprep.subr.bf16.mxu0 %v2612_v61 }
 0x10c   :  { %v345_v45 = vadd.f32 %v344_v11, %v2982_v25  ;;  %v425_v55 = vadd.f32 %v424_v13, %v2982_v25  ;;  %v683_v19 = vmul.f32 0.2, %v343_v7  ;;  %v915_v23 = vpack.c.bf16 %v807_v6, %v803_v62  ;;  %v2613_v62 = vld [vmem:[%s3599_s5 + $0x30] sm:$0xff]  }
 0x10d   :  { %v346_v20 = vpop.f32.mrf.mxu0  ;;  %v3063_v21 = vpop.f32.mrf.mxu1  ;;  %v810_v29 = vmax.f32 %v341_v63, %v682_v10  ;;  %v874_v42 = vmax.f32 %v421_v54, %v746_v17  ;;  %2369 = vmatpush3.bf16.msra.mxu0 %v2613_v62 }
 0x10e   :  { %v686_v27 = vmul.f32 0.2, %v345_v45  ;;  %v750_v28 = vmul.f32 0.2, %v425_v55  ;;  %v347_v31 = vadd.f32 %v346_v20, %v2990_v0  ;;  %1430 = vmatprep.mubr.bf16.mxu0 %v915_v23  ;;  %v811_v43 = vmax.f32 %v343_v7, %v683_v19 }
 0x10f   :  { %v350_v36 = vpop.f32.mrf.mxu0  ;;  %v430_v37 = vpop.f32.mrf.mxu1 }
 0x110   :  { %v814_v38 = vmax.f32 %v345_v45, %v686_v27  ;;  %v878_v39 = vmax.f32 %v425_v55, %v750_v28  ;;  %v351_v40 = vadd.f32 %v350_v36, %v2982_v25  ;;  %v431_v41 = vadd.f32 %v430_v37, %v2982_v25  ;;  %1431 = vmatmul.mubr.bf16.gmra.mxu0 %v914_v12 }
 0x111   :  { %v687_v14 = vmul.f32 0.2, %v347_v31  ;;  %v352_v47 = vpop.f32.mrf.mxu0  ;;  %v3068_v49 = vpop.f32.mrf.mxu1 }
 0x112   :  { %v353_v50 = vadd.f32 %v352_v47, %v2990_v0  ;;  %v3071_v57 = vpack.c.bf16 %v878_v39, %v874_v42  ;;  %v690_v58 = vmul.f32 0.2, %v351_v40  ;;  %v754_v59 = vmul.f32 0.2, %v431_v41 }
 0x113   :  { %v815_v51 = vmax.f32 %v347_v31, %v687_v14  ;;  %v354_v53 = vpop.f32.mrf.mxu0  ;;  %v434_v56 = vpop.f32.mrf.mxu1  ;;  %v918_v60 = vpack.c.bf16 %v814_v38, %v810_v29  ;;  %v121_v39 = vsub.s32 3, %v2944_v1  ;;  %v377_v42 = vadd.f32 %v2997_v30, %v2990_v0 }
 0x114   :  { %v691_v63 = vmul.f32 0.2, %v353_v50  ;;  %v355_v54 = vadd.f32 %v354_v53, %v2982_v25  ;;  %v435_v3 = vadd.f32 %v434_v56, %v2982_v25  ;;  %v818_v17 = vmax.f32 %v351_v40, %v690_v58 }
 0x115   :  { %v356_v6 = vpop.f32.mrf.mxu0  ;;  %v3081_v7 = vpop.f32.mrf.mxu1  ;;  %v919_v10 = vpack.c.bf16 %v815_v51, %v811_v43  ;;  %v882_v27 = vmax.f32 %v431_v41, %v754_v59  ;;  %v373_v56 = vadd.f32 %v2992_v18, %v2990_v0 }
 0x116   :  { %v357_v11 = vadd.f32 %v356_v6, %v2990_v0  ;;  %v694_v13 = vmul.f32 0.2, %v355_v54  ;;  %v758_v45 = vmul.f32 0.2, %v435_v3  ;;  %v819_v28 = vmax.f32 %v353_v50, %v691_v63 }
 0x117   :  { %1440 = vmatprep.mubr.bf16.mxu0 %v919_v10  ;;  %v360_v55 = vpop.f32.mrf.mxu0  ;;  %v440_v12 = vpop.f32.mrf.mxu1  ;;  %v711_v6 = vmul.f32 0.2, %v377_v42 }
 0x118   :  { %v695_v19 = vmul.f32 0.2, %v357_v11  ;;  %v361_v20 = vadd.f32 %v360_v55, %v2982_v25  ;;  %v441_v23 = vadd.f32 %v440_v12, %v2982_v25  ;;  %1441 = vmatmul.mubr.bf16.gmra.mxu0 %v918_v60  ;;  %v822_v29 = vmax.f32 %v355_v54, %v694_v13 }
 0x119   :  { %v886_v31 = vmax.f32 %v435_v3, %v758_v45  ;;  %v362_v36 = vpop.f32.mrf.mxu0  ;;  %v3086_v37 = vpop.f32.mrf.mxu1  ;;  %v3102_v3 = vrot.slane %v2950_v8, %v121_v39  ;;  %v707_v55 = vmul.f32 0.2, %v373_v56  ;;  %v2614_v8 = vld [vmem:[%s3599_s5 + $0x68] sm:$0xff]  }
 0x11a   :  { %v823_v38 = vmax.f32 %v357_v11, %v695_v19  ;;  %v698_v40 = vmul.f32 0.2, %v361_v20  ;;  %v363_v43 = vadd.f32 %v362_v36, %v2990_v0  ;;  %v922_v53 = vpack.c.bf16 %v822_v29, %v818_v17  ;;  %2370 = vmatprep.subr.bf16.mxu0 %v2614_v8 }
 0x11b   :  { %v364_v14 = vpop.f32.mrf.mxu0  ;;  %v444_v47 = vpop.f32.mrf.mxu1  ;;  %v3092_v51 = vpack.c.bf16 %v886_v31, %v882_v27  ;;  %v762_v58 = vmul.f32 0.2, %v441_v23  ;;  %v387_v29 = vadd.f32 %v3009_v44, %v2990_v0 }
 0x11c   :  { %v365_v41 = vadd.f32 %v364_v14, %v2982_v25  ;;  %v445_v50 = vadd.f32 %v444_v47, %v2982_v25  ;;  %v699_v59 = vmul.f32 0.2, %v363_v43  ;;  %v923_v30 = vpack.c.bf16 %v823_v38, %v819_v28 }
 0x11d   :  { %v366_v60 = vpop.f32.mrf.mxu0  ;;  %v3098_v61 = vpop.f32.mrf.mxu1  ;;  %v826_v10 = vmax.f32 %v361_v20, %v698_v40  ;;  %v890_v12 = vmax.f32 %v441_v23, %v762_v58  ;;  %v2615_v20 = vld [vmem:[%s3599_s5 + $0x28] sm:$0xff]   ;;  %v839_v28 = vmax.f32 %v377_v42, %v711_v6  ;;  %v383_v14 = vadd.f32 %v3002_v48, %v2990_v0 }
 0x11e   :  { %v702_v62 = vmul.f32 0.2, %v365_v41  ;;  %v766_v63 = vmul.f32 0.2, %v445_v50  ;;  %v367_v54 = vadd.f32 %v366_v60, %v2990_v0  ;;  %1450 = vmatprep.mubr.bf16.mxu0 %v923_v30  ;;  %v827_v11 = vmax.f32 %v363_v43, %v699_v59  ;;  %2371 = vmatpush3.bf16.msra.mxu0 %v2615_v20 }
 0x11f   :  { %v483_v25 = vpop.f32.mrf.mxu1  ;;  %v835_v43 = vmax.f32 %v373_v56, %v707_v55  ;;  %v715_v30 = vmul.f32 0.2, %v383_v14 }
 0x120   :  { %v830_v13 = vmax.f32 %v365_v41, %v702_v62  ;;  %v894_v18 = vmax.f32 %v445_v50, %v766_v63  ;;  %v703_v45 = vmul.f32 0.2, %v367_v54  ;;  %1451 = vmatmul.mubr.bf16.gmra.mxu0 %v922_v53  ;;  %v484_v31 = vadd.f32 %v483_v25, %v2955_v9 }
 0x121   :  { %v485_v17 = vpop.f32.mrf.mxu1  ;;  %v719_v50 = vmul.f32 0.2, %v387_v29  ;;  %v931_v59 = vpack.c.bf16 %v839_v28, %v835_v43  ;;  %v843_v55 = vmax.f32 %v383_v14, %v715_v30  ;;  %v2617_v43 = vld [vmem:[%s3599_s5 + $0x20] sm:$0xff]   ;;  %v403_v30 = vadd.f32 %v3026_v24, %v2990_v0 }
 0x122   :  { %v831_v19 = vmax.f32 %v367_v54, %v703_v45  ;;  %v486_v27 = vadd.f32 %v485_v17, %v3102_v3  ;;  %v3114_v23 = vpack.c.bf16 %v894_v18, %v890_v12  ;;  %v926_v40 = vpack.c.bf16 %v830_v13, %v826_v10 }
 0x123   :  { %v487_v36 = vpop.f32.mrf.mxu1  ;;  %v644_v53 = vmul.f32 0.2, %v484_v31  ;;  %v847_v6 = vmax.f32 %v387_v29, %v719_v50  ;;  %v397_v10 = vadd.f32 %v3021_v32, %v2990_v0  ;;  %v393_v12 = vadd.f32 %v3014_v2, %v2990_v0  ;;  %v2616_v2 = vld [vmem:[%s3599_s5 + $0x60] sm:$0xff]  }
 0x124   :  { %v488_v38 = vadd.f32 %v487_v36, %v2955_v9  ;;  %v927_v39 = vpack.c.bf16 %v831_v19, %v827_v11  ;;  %v645_v42 = vmul.f32 0.2, %v486_v27  ;;  %2372 = vmatprep.subr.bf16.mxu0 %v2616_v2 }
 0x125   :  { %v489_v47 = vpop.f32.mrf.mxu1  ;;  %v772_v25 = vmax.f32 %v484_v31, %v644_v53  ;;  %v727_v28 = vmul.f32 0.2, %v397_v10  ;;  %v935_v31 = vpack.c.bf16 %v847_v6, %v843_v55  ;;  %2373 = vmatpush3.bf16.msra.mxu0 %v2617_v43 }
 0x126   :  { %v648_v41 = vmul.f32 0.2, %v488_v38  ;;  %v490_v44 = vadd.f32 %v489_v47, %v3102_v3  ;;  %1460 = vmatprep.mubr.bf16.mxu0 %v927_v39  ;;  %v773_v63 = vmax.f32 %v486_v27, %v645_v42 }
 0x127   :  { %v493_v58 = vpop.f32.mrf.mxu1 }
 0x128   :  { %v649_v60 = vmul.f32 0.2, %v490_v44  ;;  %1461 = vmatmul.mubr.bf16.gmra.mxu0 %v926_v40  ;;  %v776_v62 = vmax.f32 %v488_v38, %v648_v41  ;;  %v494_v11 = vadd.f32 %v493_v58, %v2955_v9  ;;  %v723_v38 = vmul.f32 0.2, %v393_v12 }
 0x129   :  { %1470 = vmatprep.mubr.bf16.mxu0 %v931_v59  ;;  %v495_v56 = vpop.f32.mrf.mxu1  ;;  %v855_v41 = vmax.f32 %v397_v10, %v727_v28 }
 0x12a   :  { %v777_v54 = vmax.f32 %v490_v44, %v649_v60  ;;  %v496_v48 = vadd.f32 %v495_v56, %v3102_v3  ;;  %v900_v17 = vpack.c.bf16 %v776_v62, %v772_v25  ;;  %v652_v32 = vmul.f32 0.2, %v494_v11 }
 0x12b   :  { %v497_v13 = vpop.f32.mrf.mxu1  ;;  %v851_v60 = vmax.f32 %v393_v12, %v723_v38 }
 0x12c   :  { %v498_v18 = vadd.f32 %v497_v13, %v2955_v9  ;;  %v901_v45 = vpack.c.bf16 %v777_v54, %v773_v63  ;;  %v653_v27 = vmul.f32 0.2, %v496_v48  ;;  %v780_v44 = vmax.f32 %v494_v11, %v652_v32 }
 0x12d   :  { %v499_v19 = vpop.f32.mrf.mxu1  ;;  %v939_v25 = vpack.c.bf16 %v855_v41, %v851_v60  ;;  %v731_v13 = vmul.f32 0.2, %v403_v30 }
 0x12e   :  { %v656_v8 = vmul.f32 0.2, %v498_v18  ;;  %v500_v20 = vadd.f32 %v499_v19, %v3102_v3  ;;  %1583 = vmatprep.mubr.bf16.mxu1 %v901_v45  ;;  %v781_v14 = vmax.f32 %v496_v48, %v653_v27  ;;  %v417_v19 = vadd.f32 %v3051_v46, %v2990_v0 }
 0x12f   :  { %v503_v29 = vpop.f32.mrf.mxu1  ;;  %1584 = vmatmul.mubr.bf16.vlgmr.msra.gmra.mxu1 %v900_v17 }
 0x130   :  { %v657_v36 = vmul.f32 0.2, %v500_v20  ;;  %1471 = vmatmul.mubr.bf16.gmra.mxu0 %v3005_v52  ;;  %v784_v39 = vmax.f32 %v498_v18, %v656_v8  ;;  %v407_v52 = vadd.f32 %v3033_v4, %v2990_v0  ;;  %v504_v50 = vadd.f32 %v503_v29, %v2955_v9 }
 0x131   :  { %1480 = vmatprep.mubr.bf16.mxu0 %v935_v31  ;;  %v505_v40 = vpop.f32.mrf.mxu1  ;;  %v413_v29 = vadd.f32 %v3038_v26, %v2990_v0  ;;  %v743_v2 = vmul.f32 0.2, %v417_v19  ;;  %v2618_v26 = vld [vmem:[%s3599_s5 + $0x58] sm:$0xff]  }
 0x132   :  { %v785_v47 = vmax.f32 %v500_v20, %v657_v36  ;;  %v506_v42 = vadd.f32 %v505_v40, %v3102_v3  ;;  %v904_v56 = vpack.c.bf16 %v784_v39, %v780_v44  ;;  %v735_v4 = vmul.f32 0.2, %v407_v52  ;;  %v2619_v44 = vld [vmem:[%s3599_s5 + $0x18] sm:$0xff]   ;;  %2374 = vmatprep.subr.bf16.mxu0 %v2618_v26 }
 0x133   :  { %v507_v53 = vpop.f32.mrf.mxu1  ;;  %v660_v6 = vmul.f32 0.2, %v504_v50  ;;  %2375 = vmatpush3.bf16.msra.mxu0 %v2619_v44  ;;  %v2621_v44 = vld [vmem:[%s3599_s5 + $0x10] sm:$0xff]  }
 0x134   :  { %v508_v58 = vadd.f32 %v507_v53, %v2955_v9  ;;  %v905_v59 = vpack.c.bf16 %v785_v47, %v781_v14  ;;  %v661_v63 = vmul.f32 0.2, %v506_v42  ;;  %v863_v17 = vmax.f32 %v407_v52, %v735_v4 }
 0x135   :  { %v509_v62 = vpop.f32.mrf.mxu1  ;;  %v788_v27 = vmax.f32 %v504_v50, %v660_v6 }
 0x136   :  { %v664_v54 = vmul.f32 0.2, %v508_v58  ;;  %v510_v48 = vadd.f32 %v509_v62, %v3102_v3  ;;  %1593 = vmatprep.mubr.bf16.mxu1 %v905_v59  ;;  %v789_v24 = vmax.f32 %v506_v42, %v661_v63  ;;  %v739_v42 = vmul.f32 0.2, %v413_v29 }
 0x137   :  { %v513_v10 = vpop.f32.mrf.mxu1  ;;  %1594 = vmatmul.mubr.bf16.gmra.mxu1 %v904_v56  ;;  %v871_v59 = vmax.f32 %v417_v19, %v743_v2 }
 0x138   :  { %v665_v11 = vmul.f32 0.2, %v510_v48  ;;  %1481 = vmatmul.mubr.bf16.gmra.mxu0 %v3017_v22  ;;  %v792_v18 = vmax.f32 %v508_v58, %v664_v54  ;;  %v514_v8 = vadd.f32 %v513_v10, %v2955_v9  ;;  %v859_v22 = vmax.f32 %v403_v30, %v731_v13 }
 0x139   :  { %1490 = vmatprep.mubr.bf16.mxu0 %v939_v25  ;;  %v515_v45 = vpop.f32.mrf.mxu1  ;;  %v867_v54 = vmax.f32 %v413_v29, %v739_v42 }
 0x13a   :  { %v793_v55 = vmax.f32 %v510_v48, %v665_v11  ;;  %v516_v12 = vadd.f32 %v515_v45, %v3102_v3  ;;  %v908_v36 = vpack.c.bf16 %v792_v18, %v788_v27  ;;  %v668_v46 = vmul.f32 0.2, %v514_v8 }
 0x13b   :  { %v517_v20 = vpop.f32.mrf.mxu1  ;;  %v943_v14 = vpack.c.bf16 %v863_v17, %v859_v22  ;;  %v423_v48 = vadd.f32 %v3056_v5, %v2990_v0  ;;  %v947_v45 = vpack.c.bf16 %v871_v59, %v867_v54  ;;  %v443_v54 = vadd.f32 %v3086_v37, %v2990_v0 }
 0x13c   :  { %v518_v28 = vadd.f32 %v517_v20, %v2955_v9  ;;  %v909_v32 = vpack.c.bf16 %v793_v55, %v789_v24  ;;  %v669_v38 = vmul.f32 0.2, %v516_v12  ;;  %v796_v60 = vmax.f32 %v514_v8, %v668_v46 }
 0x13d   :  { %v519_v31 = vpop.f32.mrf.mxu1  ;;  %v747_v55 = vmul.f32 0.2, %v423_v48  ;;  %v437_v20 = vadd.f32 %v3081_v7, %v2990_v0 }
 0x13e   :  { %v672_v39 = vmul.f32 0.2, %v518_v28  ;;  %v520_v40 = vadd.f32 %v519_v31, %v3102_v3  ;;  %1603 = vmatprep.mubr.bf16.mxu1 %v909_v32  ;;  %v797_v50 = vmax.f32 %v516_v12, %v669_v38 }
 0x13f   :  { %v523_v43 = vpop.f32.mrf.mxu1  ;;  %1604 = vmatmul.mubr.bf16.gmra.mxu1 %v908_v36  ;;  %v433_v36 = vadd.f32 %v3068_v49, %v2990_v0  ;;  %v2620_v49 = vld [vmem:[%s3599_s5 + $0x50] sm:$0xff]  }
 0x140   :  { %v673_v47 = vmul.f32 0.2, %v520_v40  ;;  %1491 = vmatmul.mubr.bf16.gmra.mxu0 %v3029_v33  ;;  %v800_v41 = vmax.f32 %v518_v28, %v672_v39  ;;  %v427_v33 = vadd.f32 %v3063_v21, %v2990_v0  ;;  %v524_v30 = vadd.f32 %v523_v43, %v2955_v9  ;;  %2376 = vmatprep.subr.bf16.mxu0 %v2620_v49 }
 0x141   :  { %1500 = vmatprep.mubr.bf16.mxu0 %v943_v14  ;;  %v525_v52 = vpop.f32.mrf.mxu1  ;;  %v759_v43 = vmul.f32 0.2, %v437_v20  ;;  %2377 = vmatpush3.bf16.msra.mxu0 %v2621_v44 }
 0x142   :  { %v801_v53 = vmax.f32 %v520_v40, %v673_v47  ;;  %v526_v58 = vadd.f32 %v525_v52, %v3102_v3  ;;  %v912_v6 = vpack.c.bf16 %v800_v41, %v796_v60  ;;  %v751_v21 = vmul.f32 0.2, %v427_v33 }
 0x143   :  { %v527_v62 = vpop.f32.mrf.mxu1  ;;  %v676_v13 = vmul.f32 0.2, %v524_v30  ;;  %v755_v41 = vmul.f32 0.2, %v433_v36  ;;  %v887_v59 = vmax.f32 %v437_v20, %v759_v43  ;;  %v2623_v43 = vld [vmem:[%s3599_s5 + $0x8] sm:$0xff]  }
 0x144   :  { %v528_v56 = vadd.f32 %v527_v62, %v2955_v9  ;;  %v913_v63 = vpack.c.bf16 %v801_v53, %v797_v50  ;;  %v677_v10 = vmul.f32 0.2, %v526_v58  ;;  %v879_v8 = vmax.f32 %v427_v33, %v751_v21 }
 0x145   :  { %v529_v4 = vpop.f32.mrf.mxu1  ;;  %v804_v28 = vmax.f32 %v524_v30, %v676_v13 }
 0x146   :  { %v680_v25 = vmul.f32 0.2, %v528_v56  ;;  %v530_v11 = vadd.f32 %v529_v4, %v3102_v3  ;;  %1613 = vmatprep.mubr.bf16.mxu1 %v913_v63  ;;  %v805_v5 = vmax.f32 %v526_v58, %v677_v10  ;;  %v883_v63 = vmax.f32 %v433_v36, %v755_v41 }
 0x147   :  { %v533_v18 = vpop.f32.mrf.mxu1  ;;  %1614 = vmatmul.mubr.bf16.gmra.mxu1 %v912_v6 }
 0x148   :  { %v681_v24 = vmul.f32 0.2, %v530_v11  ;;  %1501 = vmatmul.mubr.bf16.gmra.mxu0 %v3041_v35  ;;  %v808_v12 = vmax.f32 %v528_v56, %v680_v25  ;;  %v534_v32 = vadd.f32 %v533_v18, %v2955_v9  ;;  %v875_v35 = vmax.f32 %v423_v48, %v747_v55 }
 0x149   :  { %1510 = vmatprep.mubr.bf16.mxu0 %v947_v45  ;;  %v535_v17 = vpop.f32.mrf.mxu1  ;;  %v955_v13 = vpack.c.bf16 %v887_v59, %v883_v63  ;;  %v763_v45 = vmul.f32 0.2, %v443_v54 }
 0x14a   :  { %v809_v19 = vmax.f32 %v530_v11, %v681_v24  ;;  %v536_v27 = vadd.f32 %v535_v17, %v3102_v3  ;;  %v916_v38 = vpack.c.bf16 %v808_v12, %v804_v28  ;;  %v684_v7 = vmul.f32 0.2, %v534_v32 }
 0x14b   :  { %v537_v22 = vpop.f32.mrf.mxu1  ;;  %v951_v47 = vpack.c.bf16 %v879_v8, %v875_v35  ;;  %v891_v28 = vmax.f32 %v443_v54, %v763_v45 }
 0x14c   :  { %v538_v29 = vadd.f32 %v537_v22, %v2955_v9  ;;  %v917_v31 = vpack.c.bf16 %v809_v19, %v805_v5  ;;  %v685_v40 = vmul.f32 0.2, %v536_v27  ;;  %v812_v33 = vmax.f32 %v534_v32, %v684_v7 }
 0x14d   :  { %v539_v39 = vpop.f32.mrf.mxu1 }
 0x14e   :  { %v688_v2 = vmul.f32 0.2, %v538_v29  ;;  %v540_v46 = vadd.f32 %v539_v39, %v3102_v3  ;;  %1623 = vmatprep.mubr.bf16.mxu1 %v917_v31  ;;  %v813_v50 = vmax.f32 %v536_v27, %v685_v40 }
 0x14f   :  { %v543_v14 = vpop.f32.mrf.mxu1  ;;  %1624 = vmatmul.mubr.bf16.gmra.mxu1 %v916_v38 }
 0x150   :  { %v689_v42 = vmul.f32 0.2, %v540_v46  ;;  %1511 = vmatmul.mubr.bf16.gmra.mxu0 %v3059_v16  ;;  %v816_v52 = vmax.f32 %v538_v29, %v688_v2  ;;  %v447_v16 = vadd.f32 %v3098_v61, %v2990_v0  ;;  %v544_v60 = vadd.f32 %v543_v14, %v2955_v9 }
 0x151   :  { %1520 = vmatprep.mubr.bf16.mxu0 %v951_v47  ;;  %v545_v26 = vpop.f32.mrf.mxu1 }
 0x152   :  { %v817_v53 = vmax.f32 %v540_v46, %v689_v42  ;;  %v546_v58 = vadd.f32 %v545_v26, %v3102_v3  ;;  %v920_v48 = vpack.c.bf16 %v816_v52, %v812_v33  ;;  %v767_v61 = vmul.f32 0.2, %v447_v16  ;;  %v2622_v46 = vld [vmem:[%s3599_s5 + $0x48] sm:$0xff]  }
 0x153   :  { %v547_v30 = vpop.f32.mrf.mxu1  ;;  %v692_v11 = vmul.f32 0.2, %v544_v60  ;;  %2378 = vmatprep.subr.bf16.mxu0 %v2622_v46 }
 0x154   :  { %v548_v62 = vadd.f32 %v547_v30, %v2955_v9  ;;  %v921_v56 = vpack.c.bf16 %v817_v53, %v813_v50  ;;  %v693_v6 = vmul.f32 0.2, %v546_v58  ;;  %v895_v17 = vmax.f32 %v447_v16, %v767_v61  ;;  %2379 = vmatpush3.bf16.msra.mxu0 %v2623_v43 }
 0x155   :  { %v549_v4 = vpop.f32.mrf.mxu1  ;;  %v820_v5 = vmax.f32 %v544_v60, %v692_v11 }
 0x156   :  { %v696_v10 = vmul.f32 0.2, %v548_v62  ;;  %v550_v25 = vadd.f32 %v549_v4, %v3102_v3  ;;  %1633 = vmatprep.mubr.bf16.mxu1 %v921_v56  ;;  %v821_v0 = vmax.f32 %v546_v58, %v693_v6  ;;  %v959_v38 = vpack.c.bf16 %v895_v17, %v891_v28  ;;  %v2625_v28 = vld [vmem:[%s3599_s5] sm:$0xff]  }
 0x157   :  { %v553_v21 = vpop.f32.mrf.mxu1  ;;  %1634 = vmatmul.mubr.bf16.gmra.mxu1 %v920_v48 }
 0x158   :  { %v697_v18 = vmul.f32 0.2, %v550_v25  ;;  %1521 = vmatmul.mubr.bf16.gmra.mxu0 %v3071_v57  ;;  %v824_v24 = vmax.f32 %v548_v62, %v696_v10  ;;  %v554_v19 = vadd.f32 %v553_v21, %v2955_v9 }
 0x159   :  { %1530 = vmatprep.mubr.bf16.mxu0 %v955_v13  ;;  %v555_v55 = vpop.f32.mrf.mxu1 }
 0x15a   :  { %v825_v37 = vmax.f32 %v550_v25, %v697_v18  ;;  %v556_v12 = vadd.f32 %v555_v55, %v3102_v3  ;;  %v924_v32 = vpack.c.bf16 %v824_v24, %v820_v5  ;;  %v700_v35 = vmul.f32 0.2, %v554_v19 }
 0x15b   :  { %v557_v27 = vpop.f32.mrf.mxu1 }
 0x15c   :  { %v558_v8 = vadd.f32 %v557_v27, %v2955_v9  ;;  %v925_v20 = vpack.c.bf16 %v825_v37, %v821_v0  ;;  %v701_v57 = vmul.f32 0.2, %v556_v12  ;;  %v828_v42 = vmax.f32 %v554_v19, %v700_v35 }
 0x15d   :  { %v559_v22 = vpop.f32.mrf.mxu1 }
 0x15e   :  { %v704_v29 = vmul.f32 0.2, %v558_v8  ;;  %v560_v31 = vadd.f32 %v559_v22, %v3102_v3  ;;  %1643 = vmatprep.mubr.bf16.mxu1 %v925_v20  ;;  %v829_v7 = vmax.f32 %v556_v12, %v701_v57  ;;  %v2624_v20 = vld [vmem:[%s3599_s5 + $0x40] sm:$0xff]  }
 0x15f   :  { %v563_v36 = vpop.f32.mrf.mxu1  ;;  %1644 = vmatmul.mubr.bf16.gmra.mxu1 %v924_v32  ;;  %2380 = vmatprep.subr.bf16.mxu0 %v2624_v20 }
 0x160   :  { %v705_v39 = vmul.f32 0.2, %v560_v31  ;;  %1531 = vmatmul.mubr.bf16.gmra.mxu0 %v3092_v51  ;;  %v832_v40 = vmax.f32 %v558_v8, %v704_v29  ;;  %v564_v41 = vadd.f32 %v563_v36, %v2955_v9 }
 0x161   :  { %1540 = vmatprep.mubr.bf16.mxu0 %v959_v38  ;;  %v565_v2 = vpop.f32.mrf.mxu1  ;;  %2381 = vmatpush3.bf16.msra.mxu0 %v2625_v28 }
 0x162   :  { %v833_v14 = vmax.f32 %v560_v31, %v705_v39  ;;  %v566_v47 = vadd.f32 %v565_v2, %v3102_v3  ;;  %v928_v49 = vpack.c.bf16 %v832_v40, %v828_v42  ;;  %v708_v59 = vmul.f32 0.2, %v564_v41 }
 0x163   :  { %v567_v52 = vpop.f32.mrf.mxu1 }
 0x164   :  { %v568_v51 = vadd.f32 %v567_v52, %v2955_v9  ;;  %v929_v26 = vpack.c.bf16 %v833_v14, %v829_v7  ;;  %v709_v50 = vmul.f32 0.2, %v566_v47  ;;  %v836_v54 = vmax.f32 %v564_v41, %v708_v59 }
 0x165   :  { %v569_v44 = vpop.f32.mrf.mxu1 }
 0x166   :  { %v712_v53 = vmul.f32 0.2, %v568_v51  ;;  %v570_v58 = vadd.f32 %v569_v44, %v3102_v3  ;;  %1653 = vmatprep.mubr.bf16.mxu1 %v929_v26  ;;  %v837_v62 = vmax.f32 %v566_v47, %v709_v50 }
 0x167   :  { %v573_v16 = vpop.f32.mrf.mxu1  ;;  %1654 = vmatmul.mubr.bf16.gmra.mxu1 %v928_v49 }
 0x168   :  { %v713_v33 = vmul.f32 0.2, %v570_v58  ;;  %1541 = vmatmul.mubr.bf16.gmra.mxu0 %v3114_v23  ;;  %v840_v60 = vmax.f32 %v568_v51, %v712_v53  ;;  %v574_v48 = vadd.f32 %v573_v16, %v2955_v9 }
 0x169   :  { %v575_v30 = vpop.f32.mrf.mxu1 }
 0x16a   :  { %v841_v56 = vmax.f32 %v570_v58, %v713_v33  ;;  %v576_v63 = vadd.f32 %v575_v30, %v3102_v3  ;;  %v932_v25 = vpack.c.bf16 %v840_v60, %v836_v54  ;;  %v716_v23 = vmul.f32 0.2, %v574_v48 }
 0x16b   :  { %v577_v4 = vpop.f32.mrf.mxu1 }
 0x16c   :  { %v578_v6 = vadd.f32 %v577_v4, %v2955_v9  ;;  %v933_v10 = vpack.c.bf16 %v841_v56, %v837_v62  ;;  %v717_v11 = vmul.f32 0.2, %v576_v63  ;;  %v844_v17 = vmax.f32 %v574_v48, %v716_v23 }
 0x16d   :  { %v579_v61 = vpop.f32.mrf.mxu1 }
 0x16e   :  { %v720_v21 = vmul.f32 0.2, %v578_v6  ;;  %v580_v13 = vadd.f32 %v579_v61, %v3102_v3  ;;  %1663 = vmatprep.mubr.bf16.mxu1 %v933_v10  ;;  %v845_v0 = vmax.f32 %v576_v63, %v717_v11 }
 0x16f   :  { %v583_v18 = vpop.f32.mrf.mxu1  ;;  %1664 = vmatmul.mubr.bf16.gmra.mxu1 %v932_v25 }
 0x170   :  { %v721_v45 = vmul.f32 0.2, %v580_v13  ;;  %v848_v24 = vmax.f32 %v578_v6, %v720_v21  ;;  %v584_v5 = vadd.f32 %v583_v18, %v2955_v9 }
 0x171   :  { %v585_v55 = vpop.f32.mrf.mxu1 }
 0x172   :  { %v849_v37 = vmax.f32 %v580_v13, %v721_v45  ;;  %v586_v12 = vadd.f32 %v585_v55, %v3102_v3  ;;  %v936_v32 = vpack.c.bf16 %v848_v24, %v844_v17  ;;  %v724_v35 = vmul.f32 0.2, %v584_v5 }
 0x173   :  { %v587_v19 = vpop.f32.mrf.mxu1 }
 0x174   :  { %v588_v27 = vadd.f32 %v587_v19, %v2955_v9  ;;  %v937_v8 = vpack.c.bf16 %v849_v37, %v845_v0  ;;  %v725_v57 = vmul.f32 0.2, %v586_v12  ;;  %v852_v7 = vmax.f32 %v584_v5, %v724_v35 }
 0x175   :  { %v589_v22 = vpop.f32.mrf.mxu1 }
 0x176   :  { %v728_v29 = vmul.f32 0.2, %v588_v27  ;;  %v590_v31 = vadd.f32 %v589_v22, %v3102_v3  ;;  %1673 = vmatprep.mubr.bf16.mxu1 %v937_v8  ;;  %v853_v2 = vmax.f32 %v586_v12, %v725_v57 }
 0x177   :  { %v593_v36 = vpop.f32.mrf.mxu1  ;;  %1674 = vmatmul.mubr.bf16.gmra.mxu1 %v936_v32 }
 0x178   :  { %v729_v38 = vmul.f32 0.2, %v590_v31  ;;  %v856_v39 = vmax.f32 %v588_v27, %v728_v29  ;;  %v594_v14 = vadd.f32 %v593_v36, %v2955_v9 }
 0x179   :  { %v595_v40 = vpop.f32.mrf.mxu1 }
 0x17a   :  { %v857_v46 = vmax.f32 %v590_v31, %v729_v38  ;;  %v596_v43 = vadd.f32 %v595_v40, %v3102_v3  ;;  %v940_v52 = vpack.c.bf16 %v856_v39, %v852_v7  ;;  %v732_v50 = vmul.f32 0.2, %v594_v14 }
 0x17b   :  { %v597_v47 = vpop.f32.mrf.mxu1 }
 0x17c   :  { %v598_v42 = vadd.f32 %v597_v47, %v2955_v9  ;;  %v941_v41 = vpack.c.bf16 %v857_v46, %v853_v2  ;;  %v733_v26 = vmul.f32 0.2, %v596_v43  ;;  %v860_v62 = vmax.f32 %v594_v14, %v732_v50 }
 0x17d   :  { %v599_v51 = vpop.f32.mrf.mxu1 }
 0x17e   :  { %v736_v49 = vmul.f32 0.2, %v598_v42  ;;  %v600_v44 = vadd.f32 %v599_v51, %v3102_v3  ;;  %1683 = vmatprep.mubr.bf16.mxu1 %v941_v41  ;;  %v861_v33 = vmax.f32 %v596_v43, %v733_v26 }
 0x17f   :  { %v603_v53 = vpop.f32.mrf.mxu1  ;;  %1684 = vmatmul.mubr.bf16.gmra.mxu1 %v940_v52 }
 0x180   :  { %v737_v58 = vmul.f32 0.2, %v600_v44  ;;  %v864_v59 = vmax.f32 %v598_v42, %v736_v49  ;;  %v604_v56 = vadd.f32 %v603_v53, %v2955_v9 }
 0x181   :  { %v605_v16 = vpop.f32.mrf.mxu1 }
 0x182   :  { %v865_v60 = vmax.f32 %v600_v44, %v737_v58  ;;  %v606_v30 = vadd.f32 %v605_v16, %v3102_v3  ;;  %v944_v4 = vpack.c.bf16 %v864_v59, %v860_v62  ;;  %v740_v11 = vmul.f32 0.2, %v604_v56 }
 0x183   :  { %v607_v63 = vpop.f32.mrf.mxu1 }
 0x184   :  { %v608_v54 = vadd.f32 %v607_v63, %v2955_v9  ;;  %v945_v48 = vpack.c.bf16 %v865_v60, %v861_v33  ;;  %v741_v10 = vmul.f32 0.2, %v606_v30  ;;  %v868_v0 = vmax.f32 %v604_v56, %v740_v11 }
 0x185   :  { %v609_v6 = vpop.f32.mrf.mxu1 }
 0x186   :  { %v744_v25 = vmul.f32 0.2, %v608_v54  ;;  %v610_v61 = vadd.f32 %v609_v6, %v3102_v3  ;;  %1693 = vmatprep.mubr.bf16.mxu1 %v945_v48  ;;  %v869_v45 = vmax.f32 %v606_v30, %v741_v10 }
 0x187   :  { %v613_v21 = vpop.f32.mrf.mxu1  ;;  %1694 = vmatmul.mubr.bf16.gmra.mxu1 %v944_v4 }
 0x188   :  { %v745_v13 = vmul.f32 0.2, %v610_v61  ;;  %v872_v23 = vmax.f32 %v608_v54, %v744_v25  ;;  %v614_v37 = vadd.f32 %v613_v21, %v2955_v9 }
 0x189   :  { %v615_v18 = vpop.f32.mrf.mxu1 }
 0x18a   :  { %v873_v24 = vmax.f32 %v610_v61, %v745_v13  ;;  %v616_v55 = vadd.f32 %v615_v18, %v3102_v3  ;;  %v948_v19 = vpack.c.bf16 %v872_v23, %v868_v0  ;;  %v748_v32 = vmul.f32 0.2, %v614_v37 }
 0x18b   :  { %v617_v12 = vpop.f32.mrf.mxu1 }
 0x18c   :  { %v618_v17 = vadd.f32 %v617_v12, %v2955_v9  ;;  %v949_v5 = vpack.c.bf16 %v873_v24, %v869_v45  ;;  %v749_v8 = vmul.f32 0.2, %v616_v55  ;;  %v876_v39 = vmax.f32 %v614_v37, %v748_v32 }
 0x18d   :  { %v619_v27 = vpop.f32.mrf.mxu1 }
 0x18e   :  { %v752_v20 = vmul.f32 0.2, %v618_v17  ;;  %v620_v28 = vadd.f32 %v619_v27, %v3102_v3  ;;  %1703 = vmatprep.mubr.bf16.mxu1 %v949_v5  ;;  %v877_v35 = vmax.f32 %v616_v55, %v749_v8 }
 0x18f   :  { %v623_v22 = vpop.f32.mrf.mxu1  ;;  %1704 = vmatmul.mubr.bf16.gmra.mxu1 %v948_v19 }
 0x190   :  { %v753_v57 = vmul.f32 0.2, %v620_v28  ;;  %v880_v29 = vmax.f32 %v618_v17, %v752_v20  ;;  %v624_v40 = vadd.f32 %v623_v22, %v2955_v9 }
 0x191   :  { %v625_v31 = vpop.f32.mrf.mxu1 }
 0x192   :  { %v881_v36 = vmax.f32 %v620_v28, %v753_v57  ;;  %v626_v38 = vadd.f32 %v625_v31, %v3102_v3  ;;  %v952_v7 = vpack.c.bf16 %v880_v29, %v876_v39  ;;  %v756_v52 = vmul.f32 0.2, %v624_v40 }
 0x193   :  { %v627_v2 = vpop.f32.mrf.mxu1 }
 0x194   :  { %v628_v46 = vadd.f32 %v627_v2, %v2955_v9  ;;  %v953_v43 = vpack.c.bf16 %v881_v36, %v877_v35  ;;  %v757_v47 = vmul.f32 0.2, %v626_v38  ;;  %v884_v59 = vmax.f32 %v624_v40, %v756_v52 }
 0x195   :  { %v629_v14 = vpop.f32.mrf.mxu1 }
 0x196   :  { %v760_v42 = vmul.f32 0.2, %v628_v46  ;;  %v630_v41 = vadd.f32 %v629_v14, %v3102_v3  ;;  %1713 = vmatprep.mubr.bf16.mxu1 %v953_v43  ;;  %v885_v50 = vmax.f32 %v626_v38, %v757_v47  ;;  %v1026_v43 = vld [vmem:[%s3598_s4] sm:$0x3] }
 0x197   :  { %v633_v51 = vpop.f32.mrf.mxu1  ;;  %1714 = vmatmul.mubr.bf16.gmra.mxu1 %v952_v7  ;;  %v3291_v14 = vrot.slane %v1026_v43, %v113_v34 }
 0x198   :  { %v761_v26 = vmul.f32 0.2, %v630_v41  ;;  %v888_v49 = vmax.f32 %v628_v46, %v760_v42  ;;  %v634_v16 = vadd.f32 %v633_v51, %v2955_v9  ;;  %v3297_v42 = vrot.slane %v1026_v43, %v109_v15 }
 0x199   :  { %v635_v44 = vpop.f32.mrf.mxu1 }
 0x19a   :  { %v889_v53 = vmax.f32 %v630_v41, %v761_v26  ;;  %v636_v58 = vadd.f32 %v635_v44, %v3102_v3  ;;  %v956_v62 = vpack.c.bf16 %v888_v49, %v884_v59  ;;  %v764_v4 = vmul.f32 0.2, %v634_v16 }
 0x19b   :  { %v637_v33 = vpop.f32.mrf.mxu1 }
 0x19c   :  { %v638_v60 = vadd.f32 %v637_v33, %v2955_v9  ;;  %v957_v30 = vpack.c.bf16 %v889_v53, %v885_v50  ;;  %v765_v63 = vmul.f32 0.2, %v636_v58  ;;  %v892_v11 = vmax.f32 %v634_v16, %v764_v4 }
 0x19d   :  { %v639_v56 = vpop.f32.mrf.mxu1 }
 0x19e   :  { %v768_v54 = vmul.f32 0.2, %v638_v60  ;;  %v640_v48 = vadd.f32 %v639_v56, %v3102_v3  ;;  %1723 = vmatprep.mubr.bf16.mxu1 %v957_v30  ;;  %v893_v25 = vmax.f32 %v636_v58, %v765_v63 }
 0x19f   :  { %1724 = vmatmul.mubr.bf16.gmra.mxu1 %v956_v62 }
 0x1a0   :  { %v769_v6 = vmul.f32 0.2, %v640_v48  ;;  %v896_v10 = vmax.f32 %v638_v60, %v768_v54 }
 0x1a2   :  { %v897_v61 = vmax.f32 %v640_v48, %v769_v6  ;;  %v960_v13 = vpack.c.bf16 %v896_v10, %v892_v11 }
 0x1a4   :  { %v961_v21 = vpack.c.bf16 %v897_v61, %v893_v25 }
 0x1a6   :  { %1733 = vmatprep.mubr.bf16.mxu1 %v961_v21 }
 0x1a7   :  { %1734 = vmatmul.mubr.bf16.gmra.mxu1 %v960_v13 }
 0x1af   :  { %v1392_v9 = vpop.f32.mrf.mxu0 }
 0x1b0   :  { %v1393_v49 = vadd.f32 %v1392_v9, %v3297_v42 }
 0x1b1   :  { %v1394_v23 = vpop.f32.mrf.mxu0 }
 0x1b2   :  { %v1395_v51 = vadd.f32 %v1394_v23, %v3291_v14 }
 0x1b3   :  { %v1396_v18 = vpop.f32.mrf.mxu0 }
 0x1b4   :  { %v1397_v50 = vadd.f32 %v1396_v18, %v3297_v42 }
 0x1b5   :  { %v1398_v45 = vpop.f32.mrf.mxu0 }
 0x1b6   :  { %v1399_v1 = vadd.f32 %v1398_v45, %v3291_v14 }
 0x1b7   :  { %v1402_v24 = vpop.f32.mrf.mxu0 }
 0x1b8   :  { %v1403_v4 = vadd.f32 %v1402_v24, %v3297_v42 }
 0x1b9   :  { %v1404_v55 = vpop.f32.mrf.mxu0 }
 0x1ba   :  { %v1405_v54 = vadd.f32 %v1404_v55, %v3291_v14 }
 0x1bb   :  { %v1406_v0 = vpop.f32.mrf.mxu0 }
 0x1bc   :  { %v1407_v61 = vadd.f32 %v1406_v0, %v3297_v42 }
 0x1bd   :  { %v1408_v3 = vpop.f32.mrf.mxu0 }
 0x1be   :  { %v1409_v45 = vadd.f32 %v1408_v3, %v3291_v14 }
 0x1c0   :  { %v3242_v37 = vpop.f32.mrf.mxu0 }
 0x1c1   :  { %v1413_v3 = vadd.f32 %v3242_v37, %v3297_v42 }
 0x1c2   :  { %v3244_v12 = vpop.f32.mrf.mxu0 }
 0x1c4   :  { %v3246_v17 = vpop.f32.mrf.mxu0 }
 0x1c6   :  { %v3248_v5 = vpop.f32.mrf.mxu0 }
 0x1c8   :  { %v3250_v19 = vpop.f32.mrf.mxu0 }
 0x1ca   :  { %v3252_v27 = vpop.f32.mrf.mxu0 }
 0x1cc   :  { %v3254_v8 = vpop.f32.mrf.mxu0 }
 0x1ce   :  { %v3256_v20 = vpop.f32.mrf.mxu0 }
 0x1d0   :  { %v3258_v28 = vpop.f32.mrf.mxu0 }
 0x1d2   :  { %v3260_v32 = vpop.f32.mrf.mxu0 }
 0x1d4   :  { %v3262_v22 = vpop.f32.mrf.mxu0 }
 0x1d6   :  { %v3264_v57 = vpop.f32.mrf.mxu0 }
 0x1d8   :  { %v3266_v29 = vpop.f32.mrf.mxu0 }
 0x1da   :  { %v3268_v31 = vpop.f32.mrf.mxu0 }
 0x1dc   :  { %v3270_v35 = vpop.f32.mrf.mxu0 }
 0x1de   :  { %v3272_v36 = vpop.f32.mrf.mxu0 }
 0x1e0   :  { %v3274_v38 = vpop.f32.mrf.mxu0 }
 0x1e2   :  { %v3276_v39 = vpop.f32.mrf.mxu0 }
 0x1e4   :  { %v3278_v40 = vpop.f32.mrf.mxu0 }
 0x1e6   :  { %v3280_v2 = vpop.f32.mrf.mxu0 }
 0x1e8   :  { %v3282_v46 = vpop.f32.mrf.mxu0 }
 0x1ea   :  { %v3287_v7 = vpop.f32.mrf.mxu0 }
 0x1ec   :  { %v3293_v47 = vpop.f32.mrf.mxu0 }
 0x1ee   :  { %v3299_v41 = vpop.f32.mrf.mxu0 }
 0x1ef   :  { %v1585_v52 = vpop.f32.mrf.mxu1 }
 0x1f0   :  { %v3302_v26 = vpop.f32.mrf.mxu0  ;;  %v1586_v58 = vadd.f32 %v1585_v52, %v1393_v49 }
 0x1f1   :  { %v1587_v44 = vpop.f32.mrf.mxu1 }
 0x1f2   :  { %v3306_v34 = vpop.f32.mrf.mxu0  ;;  %v1588_v53 = vadd.f32 %v1587_v44, %v1395_v51  ;;  %v1744_v56 = vmul.f32 0.2, %v1586_v58 }
 0x1f3   :  { %v1589_v59 = vpop.f32.mrf.mxu1 }
 0x1f4   :  { %v1590_v15 = vadd.f32 %v1589_v59, %v1397_v50  ;;  %v3309_v16 = vpop.f32.mrf.mxu0  ;;  %v1745_v60 = vmul.f32 0.2, %v1588_v53  ;;  %v1808_v9 = vmax.f32 %v1586_v58, %v1744_v56 }
 0x1f5   :  { %v1591_v33 = vpop.f32.mrf.mxu1 }
 0x1f6   :  { %v1746_v30 = vmul.f32 0.2, %v1590_v15  ;;  %v1592_v62 = vadd.f32 %v1591_v33, %v1399_v1  ;;  %v3313_v10 = vpop.f32.mrf.mxu0  ;;  %v1809_v11 = vmax.f32 %v1588_v53, %v1745_v60  ;;  %v1415_v53 = vadd.f32 %v3244_v12, %v3291_v14 }
 0x1f7   :  { %v1595_v63 = vpop.f32.mrf.mxu1  ;;  %v1417_v60 = vadd.f32 %v3246_v17, %v3297_v42  ;;  %v1419_v12 = vadd.f32 %v3248_v5, %v3291_v14  ;;  %v1423_v5 = vadd.f32 %v3250_v19, %v3297_v42 }
 0x1f8   :  { %v1747_v48 = vmul.f32 0.2, %v1592_v62  ;;  %v1810_v6 = vmax.f32 %v1590_v15, %v1746_v30  ;;  %v1596_v23 = vadd.f32 %v1595_v63, %v1403_v4  ;;  %v3317_v51 = vpop.f32.mrf.mxu0 }
 0x1f9   :  { %v1597_v25 = vpop.f32.mrf.mxu1 }
 0x1fa   :  { %v1811_v21 = vmax.f32 %v1592_v62, %v1747_v48  ;;  %v1598_v13 = vadd.f32 %v1597_v25, %v1405_v54  ;;  %v1872_v55 = vpack.c.bf16 %v1810_v6, %v1808_v9  ;;  %v1748_v59 = vmul.f32 0.2, %v1596_v23  ;;  %v3323_v1 = vpop.f32.mrf.mxu0 }
 0x1fb   :  { %v1599_v18 = vpop.f32.mrf.mxu1 }
 0x1fc   :  { %v1600_v43 = vadd.f32 %v1599_v18, %v1407_v61  ;;  %v1873_v52 = vpack.c.bf16 %v1811_v21, %v1809_v11  ;;  %v1749_v49 = vmul.f32 0.2, %v1598_v13  ;;  %v1812_v63 = vmax.f32 %v1596_v23, %v1748_v59  ;;  %v3329_v25 = vpop.f32.mrf.mxu0 }
 0x1fd   :  { %v1601_v24 = vpop.f32.mrf.mxu1  ;;  %v1425_v23 = vadd.f32 %v3252_v27, %v3291_v14  ;;  %v1429_v27 = vadd.f32 %v3256_v20, %v3291_v14  ;;  %v1433_v20 = vadd.f32 %v3258_v28, %v3297_v42 }
 0x1fe   :  { %v1750_v44 = vmul.f32 0.2, %v1600_v43  ;;  %v1602_v50 = vadd.f32 %v1601_v24, %v1409_v45  ;;  %2071 = vmatprep.mubr.bf16.mxu0 %v1873_v52  ;;  %v1813_v30 = vmax.f32 %v1598_v13, %v1749_v49  ;;  %v3335_v45 = vpop.f32.mrf.mxu0 }
 0x1ff   :  { %v1605_v0 = vpop.f32.mrf.mxu1  ;;  %2072 = vmatmul.mubr.bf16.vlgmr.msra.gmra.mxu0 %v1872_v55  ;;  %v1427_v55 = vadd.f32 %v3254_v8, %v3297_v42 }
 0x200   :  { %v1751_v58 = vmul.f32 0.2, %v1602_v50  ;;  %v1814_v15 = vmax.f32 %v1600_v43, %v1750_v44  ;;  %v1606_v54 = vadd.f32 %v1605_v0, %v1413_v3  ;;  %v3341_v3 = vpop.f32.mrf.mxu0 }
 0x201   :  { %v1607_v33 = vpop.f32.mrf.mxu1 }
 0x202   :  { %v1815_v62 = vmax.f32 %v1602_v50, %v1751_v58  ;;  %v1608_v56 = vadd.f32 %v1607_v33, %v1415_v53  ;;  %v1874_v61 = vpack.c.bf16 %v1814_v15, %v1812_v63  ;;  %v1752_v17 = vmul.f32 0.2, %v1606_v54 }
 0x203   :  { %v1609_v48 = vpop.f32.mrf.mxu1 }
 0x204   :  { %v1610_v4 = vadd.f32 %v1609_v48, %v1417_v60  ;;  %v1875_v6 = vpack.c.bf16 %v1815_v62, %v1813_v30  ;;  %v1753_v11 = vmul.f32 0.2, %v1608_v56  ;;  %v1816_v50 = vmax.f32 %v1606_v54, %v1752_v17  ;;  %v3347_v54 = vpop.f32.mrf.mxu0 }
 0x205   :  { %v1611_v37 = vpop.f32.mrf.mxu1 }
 0x206   :  { %v1754_v21 = vmul.f32 0.2, %v1610_v4  ;;  %v1612_v9 = vadd.f32 %v1611_v37, %v1419_v12  ;;  %2079 = vmatprep.mubr.bf16.mxu0 %v1875_v6  ;;  %v1817_v24 = vmax.f32 %v1608_v56, %v1753_v11  ;;  %v1435_v56 = vadd.f32 %v3260_v32, %v3291_v14 }
 0x207   :  { %v1615_v13 = vpop.f32.mrf.mxu1  ;;  %2080 = vmatmul.mubr.bf16.gmra.mxu0 %v1874_v61  ;;  %v1439_v32 = vadd.f32 %v3264_v57, %v3291_v14  ;;  %v1443_v57 = vadd.f32 %v3266_v29, %v3297_v42 }
 0x208   :  { %v1755_v18 = vmul.f32 0.2, %v1612_v9  ;;  %v1818_v43 = vmax.f32 %v1610_v4, %v1754_v21  ;;  %v1616_v59 = vadd.f32 %v1615_v13, %v1423_v5  ;;  %v1437_v4 = vadd.f32 %v3262_v22, %v3297_v42 }
 0x209   :  { %v1617_v52 = vpop.f32.mrf.mxu1 }
 0x20a   :  { %v1819_v49 = vmax.f32 %v1612_v9, %v1755_v18  ;;  %v1618_v44 = vadd.f32 %v1617_v52, %v1425_v23  ;;  %v1876_v15 = vpack.c.bf16 %v1818_v43, %v1816_v50  ;;  %v1756_v8 = vmul.f32 0.2, %v1616_v59  ;;  %v3353_v23 = vpop.f32.mrf.mxu0 }
 0x20b   :  { %v1619_v0 = vpop.f32.mrf.mxu1 }
 0x20c   :  { %v1620_v53 = vadd.f32 %v1619_v0, %v1427_v55  ;;  %v1877_v58 = vpack.c.bf16 %v1819_v49, %v1817_v24  ;;  %v1757_v33 = vmul.f32 0.2, %v1618_v44  ;;  %v1820_v11 = vmax.f32 %v1616_v59, %v1756_v8 }
 0x20d   :  { %v1621_v19 = vpop.f32.mrf.mxu1  ;;  %v1445_v24 = vadd.f32 %v3268_v31, %v3291_v14  ;;  %v1447_v0 = vadd.f32 %v3270_v35, %v3297_v42  ;;  %v1449_v31 = vadd.f32 %v3272_v36, %v3291_v14  ;;  %v1453_v36 = vadd.f32 %v3274_v38, %v3297_v42 }
 0x20e   :  { %v1758_v60 = vmul.f32 0.2, %v1620_v53  ;;  %v1622_v30 = vadd.f32 %v1621_v19, %v1429_v27  ;;  %2087 = vmatprep.mubr.bf16.mxu0 %v1877_v58  ;;  %v1821_v6 = vmax.f32 %v1618_v44, %v1757_v33  ;;  %v3359_v44 = vpop.f32.mrf.mxu0 }
 0x20f   :  { %v1625_v62 = vpop.f32.mrf.mxu1  ;;  %2088 = vmatmul.mubr.bf16.gmra.mxu0 %v1876_v15 }
 0x210   :  { %v1759_v63 = vmul.f32 0.2, %v1622_v30  ;;  %v1822_v48 = vmax.f32 %v1620_v53, %v1758_v60  ;;  %v1626_v21 = vadd.f32 %v1625_v62, %v1433_v20  ;;  %v3365_v8 = vpop.f32.mrf.mxu0 }
 0x211   :  { %v1627_v12 = vpop.f32.mrf.mxu1 }
 0x212   :  { %v1823_v37 = vmax.f32 %v1622_v30, %v1759_v63  ;;  %v1628_v61 = vadd.f32 %v1627_v12, %v1435_v56  ;;  %v1878_v18 = vpack.c.bf16 %v1822_v48, %v1820_v11  ;;  %v1760_v22 = vmul.f32 0.2, %v1626_v21 }
 0x213   :  { %v1629_v9 = vpop.f32.mrf.mxu1  ;;  %v1455_v12 = vadd.f32 %v3276_v39, %v3291_v14  ;;  %v1457_v11 = vadd.f32 %v3278_v40, %v3297_v42  ;;  %v1459_v39 = vadd.f32 %v3280_v2, %v3291_v14  ;;  %v1463_v2 = vadd.f32 %v3282_v46, %v3297_v42 }
 0x214   :  { %v1630_v17 = vadd.f32 %v1629_v9, %v1437_v4  ;;  %v1879_v13 = vpack.c.bf16 %v1823_v37, %v1821_v6  ;;  %v1761_v5 = vmul.f32 0.2, %v1628_v61  ;;  %v1824_v19 = vmax.f32 %v1626_v21, %v1760_v22  ;;  %v3371_v6 = vpop.f32.mrf.mxu0 }
 0x215   :  { %v1631_v28 = vpop.f32.mrf.mxu1 }
 0x216   :  { %v1762_v43 = vmul.f32 0.2, %v1630_v17  ;;  %v1632_v52 = vadd.f32 %v1631_v28, %v1439_v32  ;;  %2095 = vmatprep.mubr.bf16.mxu0 %v1879_v13  ;;  %v1825_v27 = vmax.f32 %v1628_v61, %v1761_v5 }
 0x217   :  { %v1635_v55 = vpop.f32.mrf.mxu1  ;;  %2096 = vmatmul.mubr.bf16.gmra.mxu0 %v1878_v18 }
 0x218   :  { %v1763_v49 = vmul.f32 0.2, %v1632_v52  ;;  %v1826_v50 = vmax.f32 %v1630_v17, %v1762_v43  ;;  %v1636_v15 = vadd.f32 %v1635_v55, %v1443_v57  ;;  %v3377_v43 = vpop.f32.mrf.mxu0  ;;  %v1465_v57 = vadd.f32 %v3287_v7, %v3291_v14 }
 0x219   :  { %v1637_v59 = vpop.f32.mrf.mxu1  ;;  %v1469_v7 = vadd.f32 %v3299_v41, %v3291_v14  ;;  %v1473_v41 = vadd.f32 %v3302_v26, %v3297_v42 }
 0x21a   :  { %v1827_v53 = vmax.f32 %v1632_v52, %v1763_v49  ;;  %v1638_v58 = vadd.f32 %v1637_v59, %v1445_v24  ;;  %v1880_v29 = vpack.c.bf16 %v1826_v50, %v1824_v19  ;;  %v1764_v35 = vmul.f32 0.2, %v1636_v15  ;;  %v3383_v59 = vpop.f32.mrf.mxu0 }
 0x21b   :  { %v1639_v33 = vpop.f32.mrf.mxu1 }
 0x21c   :  { %v1640_v60 = vadd.f32 %v1639_v33, %v1447_v0  ;;  %v1881_v30 = vpack.c.bf16 %v1827_v53, %v1825_v27  ;;  %v1765_v56 = vmul.f32 0.2, %v1638_v58  ;;  %v1828_v17 = vmax.f32 %v1636_v15, %v1764_v35 }
 0x21d   :  { %v1641_v62 = vpop.f32.mrf.mxu1  ;;  %v1467_v53 = vadd.f32 %v3293_v47, %v3297_v42 }
 0x21e   :  { %v1766_v63 = vmul.f32 0.2, %v1640_v60  ;;  %v1642_v20 = vadd.f32 %v1641_v62, %v1449_v31  ;;  %2103 = vmatprep.mubr.bf16.mxu0 %v1881_v30  ;;  %v1829_v21 = vmax.f32 %v1638_v58, %v1765_v56  ;;  %v3389_v62 = vpop.f32.mrf.mxu0 }
 0x21f   :  { %v1645_v48 = vpop.f32.mrf.mxu1  ;;  %2104 = vmatmul.mubr.bf16.gmra.mxu0 %v1880_v29 }
 0x220   :  { %v1767_v4 = vmul.f32 0.2, %v1642_v20  ;;  %v1830_v37 = vmax.f32 %v1640_v60, %v1766_v63  ;;  %v1646_v13 = vadd.f32 %v1645_v48, %v1453_v36  ;;  %v3395_v36 = vpop.f32.mrf.mxu0 }
 0x221   :  { %v1647_v61 = vpop.f32.mrf.mxu1 }
 0x222   :  { %v1831_v9 = vmax.f32 %v1642_v20, %v1767_v4  ;;  %v1648_v32 = vadd.f32 %v1647_v61, %v1455_v12  ;;  %v1882_v38 = vpack.c.bf16 %v1830_v37, %v1828_v17  ;;  %v1768_v40 = vmul.f32 0.2, %v1646_v13 }
 0x223   :  { %v1649_v28 = vpop.f32.mrf.mxu1  ;;  %v1475_v12 = vadd.f32 %v3306_v34, %v3291_v14  ;;  %v1479_v34 = vadd.f32 %v3313_v10, %v3291_v14  ;;  %v1483_v10 = vadd.f32 %v3317_v51, %v3297_v42 }
 0x224   :  { %v1650_v18 = vadd.f32 %v1649_v28, %v1457_v11  ;;  %v1883_v5 = vpack.c.bf16 %v1831_v9, %v1829_v21  ;;  %v1769_v22 = vmul.f32 0.2, %v1648_v32  ;;  %v1832_v33 = vmax.f32 %v1646_v13, %v1768_v40 }
 0x225   :  { %v1651_v52 = vpop.f32.mrf.mxu1  ;;  %v1477_v11 = vadd.f32 %v3309_v16, %v3297_v42  ;;  %v1485_v40 = vadd.f32 %v3323_v1, %v3291_v14  ;;  %v1489_v1 = vadd.f32 %v3335_v45, %v3291_v14  ;;  %v1493_v45 = vadd.f32 %v3341_v3, %v3297_v42 }
 0x226   :  { %v1770_v55 = vmul.f32 0.2, %v1650_v18  ;;  %v1652_v24 = vadd.f32 %v1651_v52, %v1459_v39  ;;  %2111 = vmatprep.mubr.bf16.mxu0 %v1883_v5  ;;  %v1833_v58 = vmax.f32 %v1648_v32, %v1769_v22  ;;  %v3401_v5 = vpop.f32.mrf.mxu0 }
 0x227   :  { %v1655_v49 = vpop.f32.mrf.mxu1  ;;  %2112 = vmatmul.mubr.bf16.gmra.mxu0 %v1882_v38 }
 0x228   :  { %v1771_v50 = vmul.f32 0.2, %v1652_v24  ;;  %v1834_v0 = vmax.f32 %v1650_v18, %v1770_v55  ;;  %v1656_v31 = vadd.f32 %v1655_v49, %v1463_v2 }
 0x229   :  { %v1657_v27 = vpop.f32.mrf.mxu1 }
 0x22a   :  { %v1835_v19 = vmax.f32 %v1652_v24, %v1771_v50  ;;  %v1658_v15 = vadd.f32 %v1657_v27, %v1465_v57  ;;  %v1884_v46 = vpack.c.bf16 %v1834_v0, %v1832_v33  ;;  %v1772_v47 = vmul.f32 0.2, %v1656_v31  ;;  %v3407_v57 = vpop.f32.mrf.mxu0 }
 0x22b   :  { %v1659_v60 = vpop.f32.mrf.mxu1  ;;  %v1487_v0 = vadd.f32 %v3329_v25, %v3297_v42 }
 0x22c   :  { %v1660_v30 = vadd.f32 %v1659_v60, %v1467_v53  ;;  %v1885_v29 = vpack.c.bf16 %v1835_v19, %v1833_v58  ;;  %v1773_v63 = vmul.f32 0.2, %v1658_v15  ;;  %v1836_v17 = vmax.f32 %v1656_v31, %v1772_v47 }
 0x22d   :  { %v1661_v56 = vpop.f32.mrf.mxu1 }
 0x22e   :  { %v1774_v20 = vmul.f32 0.2, %v1660_v30  ;;  %v1662_v35 = vadd.f32 %v1661_v56, %v1469_v7  ;;  %2119 = vmatprep.mubr.bf16.mxu0 %v1885_v29  ;;  %v1837_v21 = vmax.f32 %v1658_v15, %v1773_v63  ;;  %v3413_v7 = vpop.f32.mrf.mxu0 }
 0x22f   :  { %v1665_v48 = vpop.f32.mrf.mxu1  ;;  %2120 = vmatmul.mubr.bf16.gmra.mxu0 %v1884_v46 }
 0x230   :  { %v1775_v4 = vmul.f32 0.2, %v1662_v35  ;;  %v1838_v37 = vmax.f32 %v1660_v30, %v1774_v20  ;;  %v1666_v13 = vadd.f32 %v1665_v48, %v1473_v41  ;;  %v1495_v20 = vadd.f32 %v3347_v54, %v3291_v14  ;;  %v3419_v47 = vpop.f32.mrf.mxu0 }
 0x231   :  { %v1667_v61 = vpop.f32.mrf.mxu1  ;;  %v1499_v54 = vadd.f32 %v3359_v44, %v3291_v14  ;;  %v1503_v44 = vadd.f32 %v3365_v8, %v3297_v42 }
 0x232   :  { %v1839_v9 = vmax.f32 %v1662_v35, %v1775_v4  ;;  %v1668_v32 = vadd.f32 %v1667_v61, %v1475_v12  ;;  %v1886_v26 = vpack.c.bf16 %v1838_v37, %v1836_v17  ;;  %v1776_v16 = vmul.f32 0.2, %v1666_v13 }
 0x233   :  { %v1669_v28 = vpop.f32.mrf.mxu1  ;;  %v1497_v4 = vadd.f32 %v3353_v23, %v3297_v42 }
 0x234   :  { %v1670_v39 = vadd.f32 %v1669_v28, %v1477_v11  ;;  %v1887_v18 = vpack.c.bf16 %v1839_v9, %v1837_v21  ;;  %v1777_v52 = vmul.f32 0.2, %v1668_v32  ;;  %v1840_v19 = vmax.f32 %v1666_v13, %v1776_v16  ;;  %v3425_v13 = vpop.f32.mrf.mxu0 }
 0x235   :  { %v1671_v38 = vpop.f32.mrf.mxu1 }
 0x236   :  { %v1778_v22 = vmul.f32 0.2, %v1670_v39  ;;  %v1672_v55 = vadd.f32 %v1671_v38, %v1479_v34  ;;  %2127 = vmatprep.mubr.bf16.mxu0 %v1887_v18  ;;  %v1841_v27 = vmax.f32 %v1668_v32, %v1777_v52  ;;  %v1505_v38 = vadd.f32 %v3371_v6, %v3291_v14 }
 0x237   :  { %v1675_v24 = vpop.f32.mrf.mxu1  ;;  %2128 = vmatmul.mubr.bf16.gmra.mxu0 %v1886_v26 }
 0x238   :  { %v1779_v49 = vmul.f32 0.2, %v1672_v55  ;;  %v1842_v50 = vmax.f32 %v1670_v39, %v1778_v22  ;;  %v1676_v15 = vadd.f32 %v1675_v24, %v1483_v10  ;;  %v1528_v22 = vpop.f32.mrf.mxu0  ;;  %v1507_v24 = vadd.f32 %v3377_v43, %v3297_v42 }
 0x239   :  { %v1677_v2 = vpop.f32.mrf.mxu1 }
 0x23a   :  { %v1843_v53 = vmax.f32 %v1672_v55, %v1779_v49  ;;  %v1678_v58 = vadd.f32 %v1677_v2, %v1485_v40  ;;  %v1888_v51 = vpack.c.bf16 %v1842_v50, %v1840_v19  ;;  %v1780_v25 = vmul.f32 0.2, %v1676_v15 }
 0x23b   :  { %v1679_v33 = vpop.f32.mrf.mxu1 }
 0x23c   :  { %v1680_v31 = vadd.f32 %v1679_v33, %v1487_v0  ;;  %v1889_v60 = vpack.c.bf16 %v1843_v53, %v1841_v27  ;;  %v1781_v29 = vmul.f32 0.2, %v1678_v58  ;;  %v1844_v11 = vmax.f32 %v1676_v15, %v1780_v25 }
 0x23d   :  { %v1681_v30 = vpop.f32.mrf.mxu1  ;;  %v1509_v27 = vadd.f32 %v3383_v59, %v3291_v14  ;;  %v1513_v59 = vadd.f32 %v3389_v62, %v3297_v42 }
 0x23e   :  { %v1782_v46 = vmul.f32 0.2, %v1680_v31  ;;  %v1682_v56 = vadd.f32 %v1681_v30, %v1489_v1  ;;  %2135 = vmatprep.mubr.bf16.mxu0 %v1889_v60  ;;  %v1845_v41 = vmax.f32 %v1678_v58, %v1781_v29  ;;  %v3435_v58 = vpop.f32.mrf.mxu0  ;;  %v1515_v60 = vadd.f32 %v3395_v36, %v3291_v14 }
 0x23f   :  { %v1685_v63 = vpop.f32.mrf.mxu1  ;;  %2136 = vmatmul.mubr.bf16.gmra.mxu0 %v1888_v51 }
 0x240   :  { %v1783_v35 = vmul.f32 0.2, %v1682_v56  ;;  %v1846_v48 = vmax.f32 %v1680_v31, %v1782_v46  ;;  %v1686_v21 = vadd.f32 %v1685_v63, %v1493_v45  ;;  %v1534_v30 = vpop.f32.mrf.mxu0 }
 0x241   :  { %v1687_v12 = vpop.f32.mrf.mxu1 }
 0x242   :  { %v1847_v37 = vmax.f32 %v1682_v56, %v1783_v35  ;;  %v1688_v61 = vadd.f32 %v1687_v12, %v1495_v20  ;;  %v1890_v3 = vpack.c.bf16 %v1846_v48, %v1844_v11  ;;  %v1784_v23 = vmul.f32 0.2, %v1686_v21 }
 0x243   :  { %v1689_v9 = vpop.f32.mrf.mxu1  ;;  %v1517_v56 = vadd.f32 %v3401_v5, %v3297_v42  ;;  %v1519_v12 = vadd.f32 %v3407_v57, %v3291_v14 }
 0x244   :  { %v1690_v32 = vadd.f32 %v1689_v9, %v1497_v4  ;;  %v1891_v17 = vpack.c.bf16 %v1847_v37, %v1845_v41  ;;  %v1785_v34 = vmul.f32 0.2, %v1688_v61  ;;  %v1848_v50 = vmax.f32 %v1686_v21, %v1784_v23  ;;  %v1536_v41 = vpop.f32.mrf.mxu0 }
 0x245   :  { %v1691_v28 = vpop.f32.mrf.mxu1 }
 0x246   :  { %v1786_v39 = vmul.f32 0.2, %v1690_v32  ;;  %v1692_v18 = vadd.f32 %v1691_v28, %v1499_v54  ;;  %2143 = vmatprep.mubr.bf16.mxu0 %v1891_v17  ;;  %v1849_v40 = vmax.f32 %v1688_v61, %v1785_v34  ;;  %v1525_v54 = vadd.f32 %v3419_v47, %v3291_v14  ;;  %v1538_v57 = vpop.f32.mrf.mxu0 }
 0x247   :  { %v1695_v26 = vpop.f32.mrf.mxu1  ;;  %2144 = vmatmul.mubr.bf16.gmra.mxu0 %v1890_v3  ;;  %v1523_v17 = vadd.f32 %v3413_v7, %v3297_v42  ;;  %v1527_v34 = vadd.f32 %v3425_v13, %v3297_v42  ;;  %v1535_v13 = vadd.f32 %v1534_v30, %v3291_v14 }
 0x248   :  { %v1787_v52 = vmul.f32 0.2, %v1692_v18  ;;  %v1850_v55 = vmax.f32 %v1690_v32, %v1786_v39  ;;  %v1696_v2 = vadd.f32 %v1695_v26, %v1503_v44  ;;  %v1529_v44 = vadd.f32 %v1528_v22, %v3291_v14 }
 0x249   :  { %v1697_v16 = vpop.f32.mrf.mxu1 }
 0x24a   :  { %v1851_v49 = vmax.f32 %v1692_v18, %v1787_v52  ;;  %v1698_v10 = vadd.f32 %v1697_v16, %v1505_v38  ;;  %v1892_v8 = vpack.c.bf16 %v1850_v55, %v1848_v50  ;;  %v1788_v43 = vmul.f32 0.2, %v1696_v2  ;;  %v1542_v16 = vpop.f32.mrf.mxu0 }
 0x24b   :  { %v1699_v0 = vpop.f32.mrf.mxu1 }
 0x24c   :  { %v1700_v6 = vadd.f32 %v1699_v0, %v1507_v24  ;;  %v1893_v53 = vpack.c.bf16 %v1851_v49, %v1849_v40  ;;  %v1789_v15 = vmul.f32 0.2, %v1698_v10  ;;  %v1852_v35 = vmax.f32 %v1696_v2, %v1788_v43 }
 0x24d   :  { %v1701_v19 = vpop.f32.mrf.mxu1 }
 0x24e   :  { %v1790_v33 = vmul.f32 0.2, %v1700_v6  ;;  %v1702_v1 = vadd.f32 %v1701_v19, %v1509_v27  ;;  %2151 = vmatprep.mubr.bf16.mxu0 %v1893_v53  ;;  %v1853_v25 = vmax.f32 %v1698_v10, %v1789_v15  ;;  %v1533_v27 = vadd.f32 %v3435_v58, %v3297_v42 }
 0x24f   :  { %v1705_v31 = vpop.f32.mrf.mxu1  ;;  %2152 = vmatmul.mubr.bf16.gmra.mxu0 %v1892_v8  ;;  %v1537_v8 = vadd.f32 %v1536_v41, %v3297_v42 }
 0x250   :  { %v1791_v51 = vmul.f32 0.2, %v1702_v1  ;;  %v1854_v29 = vmax.f32 %v1700_v6, %v1790_v33  ;;  %v1706_v45 = vadd.f32 %v1705_v31, %v1513_v59  ;;  %v1544_v6 = vpop.f32.mrf.mxu0 }
 0x251   :  { %v1707_v46 = vpop.f32.mrf.mxu1 }
 0x252   :  { %v1855_v63 = vmax.f32 %v1702_v1, %v1791_v51  ;;  %v1708_v20 = vadd.f32 %v1707_v46, %v1515_v60  ;;  %v1894_v37 = vpack.c.bf16 %v1854_v29, %v1852_v35  ;;  %v1792_v9 = vmul.f32 0.2, %v1706_v45  ;;  %v1546_v30 = vpop.f32.mrf.mxu0 }
 0x253   :  { %v1709_v48 = vpop.f32.mrf.mxu1  ;;  %v1539_v60 = vadd.f32 %v1538_v57, %v3291_v14  ;;  %v1545_v35 = vadd.f32 %v1544_v6, %v3291_v14  ;;  %v1547_v41 = vadd.f32 %v1546_v30, %v3297_v42 }
 0x254   :  { %v1710_v36 = vadd.f32 %v1709_v48, %v1517_v56  ;;  %v1895_v4 = vpack.c.bf16 %v1855_v63, %v1853_v25  ;;  %v1793_v61 = vmul.f32 0.2, %v1708_v20  ;;  %v1856_v26 = vmax.f32 %v1706_v45, %v1792_v9 }
 0x255   :  { %v1711_v62 = vpop.f32.mrf.mxu1  ;;  %v1543_v48 = vadd.f32 %v1542_v16, %v3297_v42 }
 0x256   :  { %v1794_v11 = vmul.f32 0.2, %v1710_v36  ;;  %v1712_v21 = vadd.f32 %v1711_v62, %v1519_v12  ;;  %2159 = vmatprep.mubr.bf16.mxu0 %v1895_v4  ;;  %v1857_v39 = vmax.f32 %v1708_v20, %v1793_v61  ;;  %v1548_v12 = vpop.f32.mrf.mxu0 }
 0x257   :  { %v1715_v5 = vpop.f32.mrf.mxu1  ;;  %2160 = vmatmul.mubr.bf16.gmra.mxu0 %v1894_v37 }
 0x258   :  { %v1795_v32 = vmul.f32 0.2, %v1712_v21  ;;  %v1858_v3 = vmax.f32 %v1710_v36, %v1794_v11  ;;  %v1716_v38 = vadd.f32 %v1715_v5, %v1523_v17  ;;  %v1549_v5 = vadd.f32 %v1548_v12, %v3291_v14 }
 0x259   :  { %v1717_v28 = vpop.f32.mrf.mxu1 }
 0x25a   :  { %v1859_v18 = vmax.f32 %v1712_v21, %v1795_v32  ;;  %v1718_v23 = vadd.f32 %v1717_v28, %v1525_v54  ;;  %v1896_v24 = vpack.c.bf16 %v1858_v3, %v1856_v26  ;;  %v1796_v50 = vmul.f32 0.2, %v1716_v38 }
 0x25b   :  { %v1719_v52 = vpop.f32.mrf.mxu1 }
 0x25c   :  { %v1720_v55 = vadd.f32 %v1719_v52, %v1527_v34  ;;  %v1897_v47 = vpack.c.bf16 %v1859_v18, %v1857_v39  ;;  %v1797_v7 = vmul.f32 0.2, %v1718_v23  ;;  %v1860_v1 = vmax.f32 %v1716_v38, %v1796_v50 }
 0x25d   :  { %v1721_v40 = vpop.f32.mrf.mxu1 }
 0x25e   :  { %v1798_v49 = vmul.f32 0.2, %v1720_v55  ;;  %v1722_v10 = vadd.f32 %v1721_v40, %v1529_v44  ;;  %2167 = vmatprep.mubr.bf16.mxu0 %v1897_v47  ;;  %v1861_v19 = vmax.f32 %v1718_v23, %v1797_v7 }
 0x25f   :  { %v1725_v2 = vpop.f32.mrf.mxu1  ;;  %2168 = vmatmul.mubr.bf16.gmra.mxu0 %v1896_v24 }
 0x260   :  { %v1799_v0 = vmul.f32 0.2, %v1722_v10  ;;  %v1862_v22 = vmax.f32 %v1720_v55, %v1798_v49  ;;  %v1726_v43 = vadd.f32 %v1725_v2, %v1533_v27  ;;  %v3464_v55 = vld [vmem:[%s3600_s6] ss:$0 sm:$0xff] }
 0x261   :  { %v1727_v53 = vpop.f32.mrf.mxu1 }
 0x262   :  { %v1863_v15 = vmax.f32 %v1722_v10, %v1799_v0  ;;  %v1728_v33 = vadd.f32 %v1727_v53, %v1535_v13  ;;  %v1898_v29 = vpack.c.bf16 %v1862_v22, %v1860_v1  ;;  %v1800_v63 = vmul.f32 0.2, %v1726_v43 }
 0x263   :  { %v1729_v31 = vpop.f32.mrf.mxu1 }
 0x264   :  { %v1730_v51 = vadd.f32 %v1729_v31, %v1537_v8  ;;  %v1899_v59 = vpack.c.bf16 %v1863_v15, %v1861_v19  ;;  %v1801_v56 = vmul.f32 0.2, %v1728_v33  ;;  %v1864_v11 = vmax.f32 %v1726_v43, %v1800_v63 }
 0x265   :  { %v1731_v46 = vpop.f32.mrf.mxu1 }
 0x266   :  { %v1802_v58 = vmul.f32 0.2, %v1730_v51  ;;  %v1732_v25 = vadd.f32 %v1731_v46, %v1539_v60  ;;  %2175 = vmatprep.mubr.bf16.mxu0 %v1899_v59  ;;  %v1865_v37 = vmax.f32 %v1728_v33, %v1801_v56 }
 0x267   :  { %v1735_v20 = vpop.f32.mrf.mxu1  ;;  %2176 = vmatmul.mubr.bf16.gmra.mxu0 %v1898_v29 }
 0x268   :  { %v1803_v45 = vmul.f32 0.2, %v1732_v25  ;;  %v1866_v36 = vmax.f32 %v1730_v51, %v1802_v58  ;;  %v1736_v21 = vadd.f32 %v1735_v20, %v1543_v48 }
 0x269   :  { %v1737_v4 = vpop.f32.mrf.mxu1 }
 0x26a   :  { %v1867_v62 = vmax.f32 %v1732_v25, %v1803_v45  ;;  %v1738_v61 = vadd.f32 %v1737_v4, %v1545_v35  ;;  %v1900_v17 = vpack.c.bf16 %v1866_v36, %v1864_v11  ;;  %v1804_v39 = vmul.f32 0.2, %v1736_v21 }
 0x26b   :  { %v1739_v9 = vpop.f32.mrf.mxu1 }
 0x26c   :  { %v1740_v54 = vadd.f32 %v1739_v9, %v1547_v41  ;;  %v1901_v32 = vpack.c.bf16 %v1867_v62, %v1865_v37  ;;  %v1805_v3 = vmul.f32 0.2, %v1738_v61  ;;  %v1868_v38 = vmax.f32 %v1736_v21, %v1804_v39 }
 0x26d   :  { %v1741_v57 = vpop.f32.mrf.mxu1 }
 0x26e   :  { %v1806_v28 = vmul.f32 0.2, %v1740_v54  ;;  %v1742_v34 = vadd.f32 %v1741_v57, %v1549_v5  ;;  %2183 = vmatprep.mubr.bf16.mxu0 %v1901_v32  ;;  %v1869_v23 = vmax.f32 %v1738_v61, %v1805_v3 }
 0x26f   :  { %2184 = vmatmul.mubr.bf16.gmra.mxu0 %v1900_v17 }
 0x270   :  { %v1807_v18 = vmul.f32 0.2, %v1742_v34  ;;  %v1870_v42 = vmax.f32 %v1740_v54, %v1806_v28 }
 0x272   :  { %v1871_v26 = vmax.f32 %v1742_v34, %v1807_v18  ;;  %v1902_v44 = vpack.c.bf16 %v1870_v42, %v1868_v38 }
 0x274   :  { %v1903_v52 = vpack.c.bf16 %v1871_v26, %v1869_v23 }
 0x276   :  { %2191 = vmatprep.mubr.bf16.mxu0 %v1903_v52 }
 0x277   :  { %2192 = vmatmul.mubr.bf16.gmra.mxu0 %v1902_v44 }
 0x2bf   :  { %v2382_v14 = vpop.f32.mrf.mxu0 }
 0x2c1   :  { %v2383_v47 = vpop.f32.mrf.mxu0 }
 0x2c2   :  { %v2384_v16 = vadd.f32 %v2383_v47, %v2382_v14 }
 0x2c3   :  { %v2385_v24 = vpop.f32.mrf.mxu0 }
 0x2c4   :  { %v2074_v40 = vadd.f32 %v2384_v16, %v3464_v55 }
 0x2c5   :  { %v2386_v7 = vpop.f32.mrf.mxu0 }
 0x2c6   :  { %2200 = vst [vmem:[%s3601_s7] sm:$0xff] %v2074_v40  ;;  %v2387_v49 = vadd.f32 %v2386_v7, %v2385_v24 }
 0x2c7   :  { %v2388_v10 = vpop.f32.mrf.mxu0 }
 0x2c8   :  { %v2077_v50 = vadd.f32 %v2387_v49, %v3464_v55 }
 0x2c9   :  { %v2389_v2 = vpop.f32.mrf.mxu0 }
 0x2ca   :  { %2201 = vst [vmem:[%s3601_s7 + $0x8] sm:$0xff] %v2077_v50  ;;  %v2390_v13 = vadd.f32 %v2389_v2, %v2388_v10 }
 0x2cb   :  { %v2391_v0 = vpop.f32.mrf.mxu0 }
 0x2cc   :  { %v2082_v27 = vadd.f32 %v2390_v13, %v3464_v55 }
 0x2cd   :  { %v2392_v6 = vpop.f32.mrf.mxu0 }
 0x2ce   :  { %2202 = vst [vmem:[%s3601_s7 + $0x10] sm:$0xff] %v2082_v27  ;;  %v2393_v22 = vadd.f32 %v2392_v6, %v2391_v0 }
 0x2cf   :  { %v2394_v53 = vpop.f32.mrf.mxu0 }
 0x2d0   :  { %v2085_v8 = vadd.f32 %v2393_v22, %v3464_v55 }
 0x2d1   :  { %v2395_v19 = vpop.f32.mrf.mxu0 }
 0x2d2   :  { %2203 = vst [vmem:[%s3601_s7 + $0x18] sm:$0xff] %v2085_v8  ;;  %v2396_v15 = vadd.f32 %v2395_v19, %v2394_v53 }
 0x2d3   :  { %v2397_v33 = vpop.f32.mrf.mxu0 }
 0x2d4   :  { %v2090_v1 = vadd.f32 %v2396_v15, %v3464_v55 }
 0x2d5   :  { %v2398_v43 = vpop.f32.mrf.mxu0 }
 0x2d6   :  { %2204 = vst [vmem:[%s3601_s7 + $0x20] sm:$0xff] %v2090_v1  ;;  %v2399_v31 = vadd.f32 %v2398_v43, %v2397_v33 }
 0x2d7   :  { %v2400_v60 = vpop.f32.mrf.mxu0 }
 0x2d8   :  { %v2093_v51 = vadd.f32 %v2399_v31, %v3464_v55 }
 0x2d9   :  { %v2401_v59 = vpop.f32.mrf.mxu0 }
 0x2da   :  { %2205 = vst [vmem:[%s3601_s7 + $0x28] sm:$0xff] %v2093_v51  ;;  %v2402_v30 = vadd.f32 %v2401_v59, %v2400_v60 }
 0x2db   :  { %v2403_v29 = vpop.f32.mrf.mxu0 }
 0x2dc   :  { %v2098_v46 = vadd.f32 %v2402_v30, %v3464_v55 }
 0x2dd   :  { %v2404_v56 = vpop.f32.mrf.mxu0 }
 0x2de   :  { %2206 = vst [vmem:[%s3601_s7 + $0x30] sm:$0xff] %v2098_v46  ;;  %v2405_v58 = vadd.f32 %v2404_v56, %v2403_v29 }
 0x2df   :  { %v2406_v25 = vpop.f32.mrf.mxu0 }
 0x2e0   :  { %v2101_v63 = vadd.f32 %v2405_v58, %v3464_v55 }
 0x2e1   :  { %v2407_v20 = vpop.f32.mrf.mxu0 }
 0x2e2   :  { %2207 = vst [vmem:[%s3601_s7 + $0x38] sm:$0xff] %v2101_v63  ;;  %v2408_v35 = vadd.f32 %v2407_v20, %v2406_v25 }
 0x2e3   :  { %v2409_v45 = vpop.f32.mrf.mxu0 }
 0x2e4   :  { %v2106_v48 = vadd.f32 %v2408_v35, %v3464_v55 }
 0x2e5   :  { %v2410_v12 = vpop.f32.mrf.mxu0 }
 0x2e6   :  { %2208 = vst [vmem:[%s3601_s7 + $0x40] sm:$0xff] %v2106_v48  ;;  %v2411_v36 = vadd.f32 %v2410_v12, %v2409_v45 }
 0x2e7   :  { %v2412_v4 = vpop.f32.mrf.mxu0 }
 0x2e8   :  { %v2109_v41 = vadd.f32 %v2411_v36, %v3464_v55 }
 0x2e9   :  { %v2413_v37 = vpop.f32.mrf.mxu0 }
 0x2ea   :  { %2209 = vst [vmem:[%s3601_s7 + $0x48] sm:$0xff] %v2109_v41  ;;  %v2414_v62 = vadd.f32 %v2413_v37, %v2412_v4 }
 0x2eb   :  { %v2415_v61 = vpop.f32.mrf.mxu0 }
 0x2ec   :  { %v2114_v11 = vadd.f32 %v2414_v62, %v3464_v55 }
 0x2ed   :  { %v2416_v21 = vpop.f32.mrf.mxu0 }
 0x2ee   :  { %2210 = vst [vmem:[%s3601_s7 + $0x50] sm:$0xff] %v2114_v11  ;;  %v2417_v9 = vadd.f32 %v2416_v21, %v2415_v61 }
 0x2ef   :  { %v2418_v5 = vpop.f32.mrf.mxu0 }
 0x2f0   :  { %v2117_v54 = vadd.f32 %v2417_v9, %v3464_v55 }
 0x2f1   :  { %v2419_v32 = vpop.f32.mrf.mxu0 }
 0x2f2   :  { %2211 = vst [vmem:[%s3601_s7 + $0x58] sm:$0xff] %v2117_v54  ;;  %v2420_v17 = vadd.f32 %v2419_v32, %v2418_v5 }
 0x2f3   :  { %v2421_v57 = vpop.f32.mrf.mxu0 }
 0x2f4   :  { %v2122_v3 = vadd.f32 %v2420_v17, %v3464_v55 }
 0x2f5   :  { %v2422_v28 = vpop.f32.mrf.mxu0 }
 0x2f6   :  { %2212 = vst [vmem:[%s3601_s7 + $0x60] sm:$0xff] %v2122_v3  ;;  %v2423_v34 = vadd.f32 %v2422_v28, %v2421_v57 }
 0x2f7   :  { %v2424_v39 = vpop.f32.mrf.mxu0 }
 0x2f8   :  { %v2125_v18 = vadd.f32 %v2423_v34, %v3464_v55 }
 0x2f9   :  { %v2425_v42 = vpop.f32.mrf.mxu0 }
 0x2fa   :  { %2213 = vst [vmem:[%s3601_s7 + $0x68] sm:$0xff] %v2125_v18  ;;  %v2426_v23 = vadd.f32 %v2425_v42, %v2424_v39 }
 0x2fb   :  { %v2427_v26 = vpop.f32.mrf.mxu0 }
 0x2fc   :  { %v2130_v38 = vadd.f32 %v2426_v23, %v3464_v55 }
 0x2fd   :  { %v2428_v52 = vpop.f32.mrf.mxu0 }
 0x2fe   :  { %2214 = vst [vmem:[%s3601_s7 + $0x70] sm:$0xff] %v2130_v38  ;;  %v2429_v44 = vadd.f32 %v2428_v52, %v2427_v26 }
 0x2ff   :  { %v2430_v14 = vpop.f32.mrf.mxu0 }
 0x300   :  { %v2133_v47 = vadd.f32 %v2429_v44, %v3464_v55 }
 0x301   :  { %v2431_v16 = vpop.f32.mrf.mxu0 }
 0x302   :  { %2215 = vst [vmem:[%s3601_s7 + $0x78] sm:$0xff] %v2133_v47  ;;  %v2432_v24 = vadd.f32 %v2431_v16, %v2430_v14 }
 0x303   :  { %v2433_v40 = vpop.f32.mrf.mxu0 }
 0x304   :  { %v2138_v7 = vadd.f32 %v2432_v24, %v3464_v55 }
 0x305   :  { %v2434_v49 = vpop.f32.mrf.mxu0 }
 0x306   :  { %2216 = vst [vmem:[%s3601_s7 + $0x80] sm:$0xff] %v2138_v7  ;;  %v2435_v10 = vadd.f32 %v2434_v49, %v2433_v40 }
 0x307   :  { %v2436_v50 = vpop.f32.mrf.mxu0 }
 0x308   :  { %v2141_v2 = vadd.f32 %v2435_v10, %v3464_v55 }
 0x309   :  { %v2437_v13 = vpop.f32.mrf.mxu0 }
 0x30a   :  { %2217 = vst [vmem:[%s3601_s7 + $0x88] sm:$0xff] %v2141_v2  ;;  %v2438_v0 = vadd.f32 %v2437_v13, %v2436_v50 }
 0x30b   :  { %v2439_v27 = vpop.f32.mrf.mxu0 }
 0x30c   :  { %v2146_v6 = vadd.f32 %v2438_v0, %v3464_v55 }
 0x30d   :  { %v2440_v22 = vpop.f32.mrf.mxu0 }
 0x30e   :  { %2218 = vst [vmem:[%s3601_s7 + $0x90] sm:$0xff] %v2146_v6  ;;  %v2441_v53 = vadd.f32 %v2440_v22, %v2439_v27 }
 0x30f   :  { %v2442_v8 = vpop.f32.mrf.mxu0 }
 0x310   :  { %v2149_v19 = vadd.f32 %v2441_v53, %v3464_v55 }
 0x311   :  { %v2443_v15 = vpop.f32.mrf.mxu0 }
 0x312   :  { %2219 = vst [vmem:[%s3601_s7 + $0x98] sm:$0xff] %v2149_v19  ;;  %v2444_v33 = vadd.f32 %v2443_v15, %v2442_v8 }
 0x313   :  { %v2445_v1 = vpop.f32.mrf.mxu0 }
 0x314   :  { %v2154_v43 = vadd.f32 %v2444_v33, %v3464_v55 }
 0x315   :  { %v2446_v31 = vpop.f32.mrf.mxu0 }
 0x316   :  { %2220 = vst [vmem:[%s3601_s7 + $0xa0] sm:$0xff] %v2154_v43  ;;  %v2447_v60 = vadd.f32 %v2446_v31, %v2445_v1 }
 0x317   :  { %v2448_v51 = vpop.f32.mrf.mxu0 }
 0x318   :  { %v2157_v59 = vadd.f32 %v2447_v60, %v3464_v55 }
 0x319   :  { %v2449_v30 = vpop.f32.mrf.mxu0 }
 0x31a   :  { %2221 = vst [vmem:[%s3601_s7 + $0xa8] sm:$0xff] %v2157_v59  ;;  %v2450_v29 = vadd.f32 %v2449_v30, %v2448_v51 }
 0x31b   :  { %v2451_v46 = vpop.f32.mrf.mxu0 }
 0x31c   :  { %v2162_v56 = vadd.f32 %v2450_v29, %v3464_v55 }
 0x31d   :  { %v2452_v58 = vpop.f32.mrf.mxu0 }
 0x31e   :  { %2222 = vst [vmem:[%s3601_s7 + $0xb0] sm:$0xff] %v2162_v56  ;;  %v2453_v25 = vadd.f32 %v2452_v58, %v2451_v46 }
 0x31f   :  { %v2454_v63 = vpop.f32.mrf.mxu0 }
 0x320   :  { %v2165_v20 = vadd.f32 %v2453_v25, %v3464_v55 }
 0x321   :  { %v2455_v35 = vpop.f32.mrf.mxu0 }
 0x322   :  { %2223 = vst [vmem:[%s3601_s7 + $0xb8] sm:$0xff] %v2165_v20  ;;  %v2456_v45 = vadd.f32 %v2455_v35, %v2454_v63 }
 0x323   :  { %v2457_v48 = vpop.f32.mrf.mxu0 }
 0x324   :  { %v2170_v12 = vadd.f32 %v2456_v45, %v3464_v55 }
 0x325   :  { %v2458_v36 = vpop.f32.mrf.mxu0 }
 0x326   :  { %2224 = vst [vmem:[%s3601_s7 + $0xc0] sm:$0xff] %v2170_v12  ;;  %v2459_v4 = vadd.f32 %v2458_v36, %v2457_v48 }
 0x327   :  { %v2460_v41 = vpop.f32.mrf.mxu0 }
 0x328   :  { %v2173_v37 = vadd.f32 %v2459_v4, %v3464_v55 }
 0x329   :  { %v2461_v62 = vpop.f32.mrf.mxu0 }
 0x32a   :  { %2225 = vst [vmem:[%s3601_s7 + $0xc8] sm:$0xff] %v2173_v37  ;;  %v2462_v61 = vadd.f32 %v2461_v62, %v2460_v41 }
 0x32b   :  { %v2463_v11 = vpop.f32.mrf.mxu0 }
 0x32c   :  { %v2178_v21 = vadd.f32 %v2462_v61, %v3464_v55 }
 0x32d   :  { %v2464_v9 = vpop.f32.mrf.mxu0 }
 0x32e   :  { %2226 = vst [vmem:[%s3601_s7 + $0xd0] sm:$0xff] %v2178_v21  ;;  %v2465_v5 = vadd.f32 %v2464_v9, %v2463_v11 }
 0x32f   :  { %v2466_v54 = vpop.f32.mrf.mxu0 }
 0x330   :  { %v2181_v32 = vadd.f32 %v2465_v5, %v3464_v55 }
 0x331   :  { %v2467_v17 = vpop.f32.mrf.mxu0 }
 0x332   :  { %2227 = vst [vmem:[%s3601_s7 + $0xd8] sm:$0xff] %v2181_v32  ;;  %v2468_v57 = vadd.f32 %v2467_v17, %v2466_v54 }
 0x333   :  { %v2469_v3 = vpop.f32.mrf.mxu0 }
 0x334   :  { %v2186_v28 = vadd.f32 %v2468_v57, %v3464_v55 }
 0x335   :  { %v2470_v34 = vpop.f32.mrf.mxu0 }
 0x336   :  { %2228 = vst [vmem:[%s3601_s7 + $0xe0] sm:$0xff] %v2186_v28  ;;  %v2471_v39 = vadd.f32 %v2470_v34, %v2469_v3 }
 0x337   :  { %v2472_v18 = vpop.f32.mrf.mxu0 }
 0x338   :  { %v2189_v42 = vadd.f32 %v2471_v39, %v3464_v55 }
 0x339   :  { %v2473_v23 = vpop.f32.mrf.mxu0 }
 0x33a   :  { %2229 = vst [vmem:[%s3601_s7 + $0xe8] sm:$0xff] %v2189_v42  ;;  %v2474_v26 = vadd.f32 %v2473_v23, %v2472_v18 }
 0x33b   :  { %v2475_v38 = vpop.f32.mrf.mxu0 }
 0x33c   :  { %v2194_v52 = vadd.f32 %v2474_v26, %v3464_v55 }
 0x33d   :  { %v2476_v44 = vpop.f32.mrf.mxu0 }
 0x33e   :  { %2230 = vst [vmem:[%s3601_s7 + $0xf0] sm:$0xff] %v2194_v52  ;;  %v2477_v14 = vadd.f32 %v2476_v44, %v2475_v38 }
 0x340   :  { %v2197_v47 = vadd.f32 %v2477_v14, %v3464_v55 }
 0x342   :  { %2231 = vst [vmem:[%s3601_s7 + $0xf8] sm:$0xff] %v2197_v47 }
 0x343   :  { %2236 = vsyncpa [#allocation3], 1 }

</bundles_post_ra>
